<compile_context>
chip_gen: v7x
topology: tpu7x:2x2x1
jax: 0.10.0
libtpu: 0.0.40
codegen_flags: <defaults>
</compile_context>

<pallas_src>
import functools

import jax
import jax.numpy as jnp
from jax.experimental import pallas as pl
from jax.experimental.pallas import tpu as pltpu


LN_EPS = 1e-5  # matches nn.LayerNorm default


def _round_up(x, m):
    return ((x + m - 1) // m) * m


def _row_tile(rows):
    """Pick (row_tile, padded_rows) for a flattened (rows, E) matmul grid."""
    if rows <= 512:
        rp = _round_up(rows, 8)
        return rp, rp                      # single sublane-aligned tile
    tm = 256
    return tm, _round_up(rows, tm)


def _col_tile(cols):
    """Pick a lane-dense output tile for wide (vocab) projections."""
    for tv in (2048, 1024, 512, 256, 128):
        if cols % tv == 0:
            return tv
    return cols                            # small / ragged vocab: one full tile


# --------------------------------------------------------------------------
# Kernels
# --------------------------------------------------------------------------
def fused_attention_ln_kernel(xq_ref, xkv_ref, mask_ref,
                              wq_ref, bq_ref, wkv_ref, bkv_ref,
                              wo_ref, bo_ref, g_ref, beta_ref,
                              out_ref, *, heads, head_dim, eps):
    """SelfAttention + output proj + residual-add + LayerNorm, one batch elem.

    xq_ref:  (1, Lq, E) f32  -- query input; also the residual branch.
    xkv_ref: (1, Lk, E) f32  -- key/value input (== xq for self-attention).
    mask_ref:(1, 1, Lq, Lk) f32 -- {0,1}; broadcast over heads inside.
    wq_ref:  (E, E)  bf16 (pre-scaled by 1/sqrt(E));  bq_ref: (1, E)  f32.
    wkv_ref: (E, 2E) bf16 [K | V];                    bkv_ref:(1, 2E) f32.
    wo_ref:  (H, D, E) bf16 (fc_out weight split per head); bo_ref: (1, E) f32.
    g_ref/beta_ref: (1, E) f32 LayerNorm params.
    out_ref: (1, Lq, E) f32.
    """
    E = heads * head_dim
    xq = xq_ref[0]                                   # (Lq, E) f32 (residual)
    xkv = xkv_ref[0]                                 # (Lk, E) f32

    xq_b = xq.astype(jnp.bfloat16)
    xkv_b = xkv.astype(jnp.bfloat16)

    # Projections (bf16 MXU, f32 accumulation). Softmax scale already in wq.
    q = jnp.dot(xq_b, wq_ref[...], preferred_element_type=jnp.float32) + bq_ref[...]
    kv = jnp.dot(xkv_b, wkv_ref[...], preferred_element_type=jnp.float32) + bkv_ref[...]
    k = kv[:, :E]
    v = kv[:, E:]

    qb = q.astype(jnp.bfloat16)
    kb = k.astype(jnp.bfloat16)
    vb = v.astype(jnp.bfloat16)

    # Additive mask bias, computed once and shared across heads.
    mbias = jnp.where(mask_ref[0, 0] == 0.0,
                      jnp.float32(-1e20), jnp.float32(0.0))        # (Lq, Lk)

    # Contract last dims directly (q @ k^T) without materializing a transpose.
    nt_dims = (((1,), (1,)), ((), ()))

    acc = jnp.zeros(xq.shape, jnp.float32)           # (Lq, E) f32
    for h in range(heads):                           # static unroll over heads
        lo = h * head_dim
        qh = qb[:, lo:lo + head_dim]                 # (Lq, D)
        kh = kb[:, lo:lo + head_dim]                 # (Lk, D)
        vh = vb[:, lo:lo + head_dim]                 # (Lk, D)

        energy = jax.lax.dot_general(qh, kh, nt_dims,
                                     preferred_element_type=jnp.float32)
        energy = energy + mbias                      # (Lq, Lk)

        emax = jnp.max(energy, axis=-1, keepdims=True)
        p = jnp.exp(energy - emax)
        p = p * pl.reciprocal(jnp.sum(p, axis=-1, keepdims=True), approx=True)

        ctx = jnp.dot(p.astype(jnp.bfloat16), vh,
                      preferred_element_type=jnp.float32)          # (Lq, D)
        # fc_out(concat(heads)) == sum_h ctx_h @ Wo[h]  -> no concatenate.
        acc = acc + jnp.dot(ctx.astype(jnp.bfloat16), wo_ref[h],
                            preferred_element_type=jnp.float32)

    # Output-projection bias + residual (residual = query input), then LN.
    y = acc + bo_ref[...] + xq
    mean = jnp.mean(y, axis=-1, keepdims=True)
    var = jnp.mean((y - mean) ** 2, axis=-1, keepdims=True)
    xn = (y - mean) * jax.lax.rsqrt(var + eps)
    out_ref[0] = xn * g_ref[...] + beta_ref[...]


def fused_ffn_ln_kernel(x_ref, w1_ref, b1_ref, w2_ref, b2_ref,
                        g_ref, beta_ref, out_ref, *, eps):
    """Linear -> ReLU -> Linear -> residual-add -> LayerNorm on a row tile."""
    x = x_ref[...]                                   # (TM, E) f32
    h = jnp.dot(x.astype(jnp.bfloat16), w1_ref[...],
                preferred_element_type=jnp.float32) + b1_ref[...]
    h = jnp.maximum(h, 0.0)
    y = jnp.dot(h.astype(jnp.bfloat16), w2_ref[...],
                preferred_element_type=jnp.float32) + b2_ref[...]
    y = y + x                                        # residual
    mean = jnp.mean(y, axis=-1, keepdims=True)
    var = jnp.mean((y - mean) ** 2, axis=-1, keepdims=True)
    xn = (y - mean) * jax.lax.rsqrt(var + eps)
    out_ref[...] = xn * g_ref[...] + beta_ref[...]


def linear_kernel(x_ref, w_ref, b_ref, o_ref):
    """(TM, E) @ (E, TV) + (1, TV) output tile of the vocab projection."""
    o_ref[...] = (jnp.dot(x_ref[...].astype(jnp.bfloat16), w_ref[...],
                          preferred_element_type=jnp.float32) + b_ref[...])


# --------------------------------------------------------------------------
# Wrappers (pallas_call glue)
# --------------------------------------------------------------------------
def pallas_attention_ln(x_q, x_kv, mask, p, heads, eps=LN_EPS):
    N, Lq, E = x_q.shape
    Lk = x_kv.shape[1]
    head_dim = E // heads
    # Broadcast only the query dim (not heads); stays (N, 1, Lq, Lk).
    mask_b = jnp.broadcast_to(mask.astype(jnp.float32), (N, 1, Lq, Lk))

    kern = functools.partial(fused_attention_ln_kernel,
                             heads=heads, head_dim=head_dim, eps=eps)
    return pl.pallas_call(
        kern,
        out_shape=jax.ShapeDtypeStruct((N, Lq, E), jnp.float32),
        grid=(N,),
        in_specs=[
            pl.BlockSpec((1, Lq, E), lambda n: (n, 0, 0)),          # x_q
            pl.BlockSpec((1, Lk, E), lambda n: (n, 0, 0)),          # x_kv
            pl.BlockSpec((1, 1, Lq, Lk), lambda n: (n, 0, 0, 0)),   # mask
            pl.BlockSpec((E, E), lambda n: (0, 0)),                 # wq (scaled)
            pl.BlockSpec((1, E), lambda n: (0, 0)),                 # bq
            pl.BlockSpec((E, 2 * E), lambda n: (0, 0)),             # wkv
            pl.BlockSpec((1, 2 * E), lambda n: (0, 0)),             # bkv
            pl.BlockSpec((heads, head_dim, E), lambda n: (0, 0, 0)),  # wo
            pl.BlockSpec((1, E), lambda n: (0, 0)),                 # bo
            pl.BlockSpec((1, E), lambda n: (0, 0)),                 # ln gamma
            pl.BlockSpec((1, E), lambda n: (0, 0)),                 # ln beta
        ],
        out_specs=pl.BlockSpec((1, Lq, E), lambda n: (n, 0, 0)),
        compiler_params=pltpu.CompilerParams(
            dimension_semantics=("parallel",)),
    )(x_q, x_kv, mask_b,
      p["wq"], p["bq"], p["wkv"], p["bkv"], p["wo"], p["bo"],
      p["ln_g"], p["ln_b"])


def pallas_ffn_ln(x, p, eps=LN_EPS):
    N, L, E = x.shape
    F = p["w1"].shape[1]
    R = N * L
    x2 = x.reshape(R, E)
    TM, Rp = _row_tile(R)
    if Rp != R:
        x2 = jnp.pad(x2, ((0, Rp - R), (0, 0)))

    kern = functools.partial(fused_ffn_ln_kernel, eps=eps)
    out = pl.pallas_call(
        kern,
        out_shape=jax.ShapeDtypeStruct((Rp, E), jnp.float32),
        grid=(Rp // TM,),
        in_specs=[
            pl.BlockSpec((TM, E), lambda i: (i, 0)),
            pl.BlockSpec((E, F), lambda i: (0, 0)),
            pl.BlockSpec((1, F), lambda i: (0, 0)),
            pl.BlockSpec((F, E), lambda i: (0, 0)),
            pl.BlockSpec((1, E), lambda i: (0, 0)),
            pl.BlockSpec((1, E), lambda i: (0, 0)),
            pl.BlockSpec((1, E), lambda i: (0, 0)),
        ],
        out_specs=pl.BlockSpec((TM, E), lambda i: (i, 0)),
        compiler_params=pltpu.CompilerParams(
            dimension_semantics=("parallel",)),
    )(x2, p["w1"], p["b1"], p["w2"], p["b2"], p["ln_g"], p["ln_b"])
    if Rp != R:
        out = out[:R]
    return out.reshape(N, L, E)


def pallas_linear(x, w, b):
    N, L, E = x.shape
    V = w.shape[1]
    R = N * L
    x2 = x.reshape(R, E)
    TM, Rp = _row_tile(R)
    if Rp != R:
        x2 = jnp.pad(x2, ((0, Rp - R), (0, 0)))
    TV = _col_tile(V)

    out = pl.pallas_call(
        linear_kernel,
        out_shape=jax.ShapeDtypeStruct((Rp, V), jnp.float32),
        grid=(Rp // TM, V // TV),
        in_specs=[
            pl.BlockSpec((TM, E), lambda i, j: (i, 0)),
            pl.BlockSpec((E, TV), lambda i, j: (0, j)),
            pl.BlockSpec((1, TV), lambda i, j: (0, j)),
        ],
        out_specs=pl.BlockSpec((TM, TV), lambda i, j: (i, j)),
        compiler_params=pltpu.CompilerParams(
            dimension_semantics=("parallel", "parallel")),
    )(x2, w, b)
    if Rp != R:
        out = out[:R]
    return out.reshape(N, L, V)


# --------------------------------------------------------------------------
# Model composition (plain JAX glue around 3 fused kernels per layer)
# --------------------------------------------------------------------------
def decoder_block_forward(bp, x, enc_out, src_mask, tgt_mask, heads):
    # Masked self-attention + out-proj + residual + LayerNorm (dropout = id).
    query = pallas_attention_ln(x, x, tgt_mask, bp["sa"], heads)
    # Cross-attention (k/v = enc_out, q = query) + residual + LayerNorm.
    x2 = pallas_attention_ln(query, enc_out, src_mask, bp["ca"], heads)
    # Feed-forward + residual + LayerNorm.
    return pallas_ffn_ln(x2, bp["ffn"])


def decoder_forward(params, x_ids, enc_out, src_mask, tgt_mask, heads):
    N, seq_len = x_ids.shape
    positions = jnp.broadcast_to(jnp.arange(seq_len), (N, seq_len))
    # TODO(synk): embedding gather (data-dependent) stays in plain JAX.
    x = jnp.take(params["word_emb"], x_ids, axis=0) \
        + jnp.take(params["pos_emb"], positions, axis=0)
    for bp in params["layers"]:
        x = decoder_block_forward(bp, x, enc_out, src_mask, tgt_mask, heads)
    return pallas_linear(x, params["fc_w"], params["fc_b"])


# --------------------------------------------------------------------------
# Deterministic parameter init (synthetic, PyTorch-equivalent shapes; weights
# pre-transposed so y = x @ W + b; matmul weights stored in bf16; the
# 1/sqrt(embed_size) softmax scale is folded into wq/bq; K,V weights fused).
# --------------------------------------------------------------------------
def _attn_params(key, E, heads, ln):
    ks = jax.random.split(key, 4)
    scale = 1.0 / (float(E) ** 0.5)

    def w(k, shape):
        return 0.02 * jax.random.normal(k, shape, jnp.float32)

    wq = (w(ks[0], (E, E)) * scale).astype(jnp.bfloat16)
    bq = (jnp.zeros((1, E), jnp.float32) * scale)
    wk = w(ks[1], (E, E))
    wv = w(ks[2], (E, E))
    wkv = jnp.concatenate([wk, wv], axis=1).astype(jnp.bfloat16)      # (E, 2E)
    bkv = jnp.zeros((1, 2 * E), jnp.float32)
    head_dim = E // heads
    wo = w(ks[3], (E, E)).reshape(heads, head_dim, E).astype(jnp.bfloat16)
    bo = jnp.zeros((1, E), jnp.float32)
    return dict(wq=wq, bq=bq, wkv=wkv, bkv=bkv, wo=wo, bo=bo,
                ln_g=ln[0], ln_b=ln[1])


def _ln_params(E):
    return (jnp.ones((1, E), jnp.float32), jnp.zeros((1, E), jnp.float32))


def init_decoder_params(key, vocab, E, heads, num_layers, fexp, max_length):
    F = fexp * E
    keys = jax.random.split(key, 3 + num_layers)
    params = dict(
        word_emb=0.02 * jax.random.normal(keys[0], (vocab, E), jnp.float32),
        pos_emb=0.02 * jax.random.normal(keys[1], (max_length, E), jnp.float32),
        fc_w=(0.02 * jax.random.normal(keys[2], (E, vocab), jnp.float32)
              ).astype(jnp.bfloat16),
        fc_b=jnp.zeros((1, vocab), jnp.float32),
        layers=[],
    )
    for li in range(num_layers):
        lk = jax.random.split(keys[3 + li], 4)
        layer = dict(
            sa=_attn_params(lk[0], E, heads, _ln_params(E)),   # + DecoderBlock.norm
            ca=_attn_params(lk[1], E, heads, _ln_params(E)),   # + TransformerBlock.norm1
            ffn=dict(
                w1=(0.02 * jax.random.normal(lk[2], (E, F), jnp.float32)
                    ).astype(jnp.bfloat16),
                b1=jnp.zeros((1, F), jnp.float32),
                w2=(0.02 * jax.random.normal(lk[3], (F, E), jnp.float32)
                    ).astype(jnp.bfloat16),
                b2=jnp.zeros((1, E), jnp.float32),
                ln_g=_ln_params(E)[0],                          # norm2
                ln_b=_ln_params(E)[1],
            ),
        )
        params["layers"].append(layer)
    return params


# --------------------------------------------------------------------------
if __name__ == "__main__":
    # Small config consistent with the module's forward.
    N, seq_len, src_len = 2, 8, 8
    vocab, E, heads, num_layers, fexp, max_length = 50, 32, 4, 2, 4, 16

    key = jax.random.PRNGKey(0)
    k_ids, k_enc, k_par = jax.random.split(key, 3)

    x_ids = jax.random.randint(k_ids, (N, seq_len), 0, vocab)
    enc_out = jax.random.normal(k_enc, (N, src_len, E), jnp.float32)

    # src_mask: attend to all encoder positions; tgt_mask: causal.
    src_mask = jnp.ones((N, 1, 1, src_len), jnp.float32)
    tgt_mask = jnp.broadcast_to(
        jnp.tril(jnp.ones((seq_len, seq_len), jnp.float32))[None, None],
        (N, 1, seq_len, seq_len))

    params = init_decoder_params(k_par, vocab, E, heads, num_layers,
                                 fexp, max_length)

    fwd = jax.jit(functools.partial(decoder_forward, heads=heads))
    logits = fwd(params, x_ids, enc_out, src_mask, tgt_mask)
    jax.block_until_ready(logits)

    assert logits.shape == (N, seq_len, vocab), logits.shape
    assert jnp.all(jnp.isfinite(logits))
    print("KERNEL_OK")
</pallas_src>

<mosaic_0001>
module attributes {stable_mosaic.version = 11 : i64} {
  func.func @fused_ffn_ln_kernel(%arg0: i32, %arg1: memref<16x32xf32, #tpu.memory_space<vmem>>, %arg2: memref<32x128xbf16, #tpu.memory_space<vmem>>, %arg3: memref<1x128xf32, #tpu.memory_space<vmem>>, %arg4: memref<128x32xbf16, #tpu.memory_space<vmem>>, %arg5: memref<1x32xf32, #tpu.memory_space<vmem>>, %arg6: memref<1x32xf32, #tpu.memory_space<vmem>>, %arg7: memref<1x32xf32, #tpu.memory_space<vmem>>, %arg8: memref<16x32xf32, #tpu.memory_space<vmem>>) attributes {dimension_semantics = [#tpu.dimension_semantics<parallel>], iteration_bounds = array<i64: 1>, scalar_prefetch = 0 : i64, scratch_operands = 0 : i64, tpu.core_type = #tpu.core_type<tc>, window_params = [{transform_indices = @transform_0, window_bounds = array<i64: 16, 32>}, {pipeline_mode = #tpu.pipeline_mode<synchronous>, transform_indices = @transform_1, window_bounds = array<i64: 32, 128>}, {pipeline_mode = #tpu.pipeline_mode<synchronous>, transform_indices = @transform_2, window_bounds = array<i64: 1, 128>}, {pipeline_mode = #tpu.pipeline_mode<synchronous>, transform_indices = @transform_3, window_bounds = array<i64: 128, 32>}, {pipeline_mode = #tpu.pipeline_mode<synchronous>, transform_indices = @transform_4, window_bounds = array<i64: 1, 32>}, {pipeline_mode = #tpu.pipeline_mode<synchronous>, transform_indices = @transform_5, window_bounds = array<i64: 1, 32>}, {pipeline_mode = #tpu.pipeline_mode<synchronous>, transform_indices = @transform_6, window_bounds = array<i64: 1, 32>}, {transform_indices = @transform_7, window_bounds = array<i64: 16, 32>}]} {
    %c0 = arith.constant 0 : index
    %c0_0 = arith.constant 0 : index
    %0 = vector.load %arg1[%c0, %c0_0] : memref<16x32xf32, #tpu.memory_space<vmem>>, vector<16x32xf32>
    %1 = arith.truncf %0 : vector<16x32xf32> to vector<16x32xbf16>
    %c0_1 = arith.constant 0 : index
    %c0_2 = arith.constant 0 : index
    %2 = vector.load %arg2[%c0_1, %c0_2] : memref<32x128xbf16, #tpu.memory_space<vmem>>, vector<32x128xbf16>
    %cst = arith.constant dense<0.000000e+00> : vector<16x128xf32>
    %3 = tpu.matmul %1, %2, %cst {dimension_numbers = #tpu.dot_dimension_numbers<[1], [0], [0], [1], [0, 0, 1, 1], [], []>} : vector<16x32xbf16>, vector<32x128xbf16>, vector<16x128xf32> -> vector<16x128xf32>
    %c0_3 = arith.constant 0 : index
    %c0_4 = arith.constant 0 : index
    %4 = vector.load %arg3[%c0_3, %c0_4] : memref<1x128xf32, #tpu.memory_space<vmem>>, vector<1x128xf32>
    %5 = vector.broadcast %4 : vector<1x128xf32> to vector<16x128xf32>
    %6 = arith.addf %3, %5 : vector<16x128xf32>
    %cst_5 = arith.constant 0.000000e+00 : f32
    %7 = vector.broadcast %cst_5 : f32 to vector<16x128xf32>
    %8 = arith.maximumf %6, %7 : vector<16x128xf32>
    %9 = arith.truncf %8 : vector<16x128xf32> to vector<16x128xbf16>
    %c0_6 = arith.constant 0 : index
    %c0_7 = arith.constant 0 : index
    %10 = vector.load %arg4[%c0_6, %c0_7] : memref<128x32xbf16, #tpu.memory_space<vmem>>, vector<128x32xbf16>
    %cst_8 = arith.constant dense<0.000000e+00> : vector<16x32xf32>
    %11 = tpu.matmul %9, %10, %cst_8 {dimension_numbers = #tpu.dot_dimension_numbers<[1], [0], [0], [1], [0, 0, 1, 1], [], []>} : vector<16x128xbf16>, vector<128x32xbf16>, vector<16x32xf32> -> vector<16x32xf32>
    %c0_9 = arith.constant 0 : index
    %c0_10 = arith.constant 0 : index
    %12 = vector.load %arg5[%c0_9, %c0_10] : memref<1x32xf32, #tpu.memory_space<vmem>>, vector<1x32xf32>
    %13 = vector.broadcast %12 : vector<1x32xf32> to vector<16x32xf32>
    %14 = arith.addf %11, %13 : vector<16x32xf32>
    %15 = arith.addf %14, %0 : vector<16x32xf32>
    %cst_11 = arith.constant dense<0.000000e+00> : vector<16xf32>
    %16 = vector.multi_reduction <add>, %15, %cst_11 [1] : vector<16x32xf32> to vector<16xf32>
    %17 = vector.shape_cast %16 : vector<16xf32> to vector<16x1xf32>
    %cst_12 = arith.constant 3.200000e+01 : f32
    %18 = vector.broadcast %cst_12 : f32 to vector<16x1xf32>
    %19 = arith.divf %17, %18 : vector<16x1xf32>
    %20 = vector.broadcast %19 : vector<16x1xf32> to vector<16x32xf32>
    %21 = arith.subf %15, %20 : vector<16x32xf32>
    %22 = arith.mulf %21, %21 : vector<16x32xf32>
    %cst_13 = arith.constant dense<0.000000e+00> : vector<16xf32>
    %23 = vector.multi_reduction <add>, %22, %cst_13 [1] : vector<16x32xf32> to vector<16xf32>
    %24 = vector.shape_cast %23 : vector<16xf32> to vector<16x1xf32>
    %cst_14 = arith.constant 3.200000e+01 : f32
    %25 = vector.broadcast %cst_14 : f32 to vector<16x1xf32>
    %26 = arith.divf %24, %25 : vector<16x1xf32>
    %27 = vector.broadcast %19 : vector<16x1xf32> to vector<16x32xf32>
    %28 = arith.subf %15, %27 : vector<16x32xf32>
    %cst_15 = arith.constant 9.99999974E-6 : f32
    %29 = vector.broadcast %cst_15 : f32 to vector<16x1xf32>
    %30 = arith.addf %26, %29 : vector<16x1xf32>
    %31 = math.rsqrt %30 : vector<16x1xf32>
    %32 = vector.broadcast %31 : vector<16x1xf32> to vector<16x32xf32>
    %33 = arith.mulf %28, %32 : vector<16x32xf32>
    %c0_16 = arith.constant 0 : index
    %c0_17 = arith.constant 0 : index
    %34 = vector.load %arg6[%c0_16, %c0_17] : memref<1x32xf32, #tpu.memory_space<vmem>>, vector<1x32xf32>
    %35 = vector.broadcast %34 : vector<1x32xf32> to vector<16x32xf32>
    %36 = arith.mulf %33, %35 : vector<16x32xf32>
    %c0_18 = arith.constant 0 : index
    %c0_19 = arith.constant 0 : index
    %37 = vector.load %arg7[%c0_18, %c0_19] : memref<1x32xf32, #tpu.memory_space<vmem>>, vector<1x32xf32>
    %38 = vector.broadcast %37 : vector<1x32xf32> to vector<16x32xf32>
    %39 = arith.addf %36, %38 : vector<16x32xf32>
    %c0_20 = arith.constant 0 : index
    %c0_21 = arith.constant 0 : index
    %40 = vector.load %arg8[%c0_20, %c0_21] : memref<16x32xf32, #tpu.memory_space<vmem>>, vector<16x32xf32>
    tpu.vector_store %arg8[%c0_20, %c0_21], %39 {strides = array<i32>} : memref<16x32xf32, #tpu.memory_space<vmem>>, vector<16x32xf32>,
    return
  }
  func.func @transform_0(%arg0: i32) -> (i32, i32) {
    %c0_i32 = arith.constant 0 : i32
    %c0_i32_0 = arith.constant 0 : i32
    return %arg0, %c0_i32 : i32, i32
  }
  func.func @transform_1(%arg0: i32) -> (i32, i32) {
    %c0_i32 = arith.constant 0 : i32
    %c0_i32_0 = arith.constant 0 : i32
    %c0_i32_1 = arith.constant 0 : i32
    return %c0_i32, %c0_i32_0 : i32, i32
  }
  func.func @transform_2(%arg0: i32) -> (i32, i32) {
    %c0_i32 = arith.constant 0 : i32
    %c0_i32_0 = arith.constant 0 : i32
    %c0_i32_1 = arith.constant 0 : i32
    return %c0_i32, %c0_i32_0 : i32, i32
  }
  func.func @transform_3(%arg0: i32) -> (i32, i32) {
    %c0_i32 = arith.constant 0 : i32
    %c0_i32_0 = arith.constant 0 : i32
    %c0_i32_1 = arith.constant 0 : i32
    return %c0_i32, %c0_i32_0 : i32, i32
  }
  func.func @transform_4(%arg0: i32) -> (i32, i32) {
    %c0_i32 = arith.constant 0 : i32
    %c0_i32_0 = arith.constant 0 : i32
    %c0_i32_1 = arith.constant 0 : i32
    return %c0_i32, %c0_i32_0 : i32, i32
  }
  func.func @transform_5(%arg0: i32) -> (i32, i32) {
    %c0_i32 = arith.constant 0 : i32
    %c0_i32_0 = arith.constant 0 : i32
    %c0_i32_1 = arith.constant 0 : i32
    return %c0_i32, %c0_i32_0 : i32, i32
  }
  func.func @transform_6(%arg0: i32) -> (i32, i32) {
    %c0_i32 = arith.constant 0 : i32
    %c0_i32_0 = arith.constant 0 : i32
    %c0_i32_1 = arith.constant 0 : i32
    return %c0_i32, %c0_i32_0 : i32, i32
  }
  func.func @transform_7(%arg0: i32) -> (i32, i32) {
    %c0_i32 = arith.constant 0 : i32
    %c0_i32_0 = arith.constant 0 : i32
    return %arg0, %c0_i32 : i32, i32
  }
}

module attributes {stable_mosaic.version = 11 : i64} {
  func.func @linear_kernel(%arg0: i32, %arg1: i32, %arg2: memref<16x32xf32, #tpu.memory_space<vmem>>, %arg3: memref<32x50xbf16, #tpu.memory_space<vmem>>, %arg4: memref<1x50xf32, #tpu.memory_space<vmem>>, %arg5: memref<16x50xf32, #tpu.memory_space<vmem>>) attributes {dimension_semantics = [#tpu.dimension_semantics<parallel>, #tpu.dimension_semantics<parallel>], iteration_bounds = array<i64: 1, 1>, scalar_prefetch = 0 : i64, scratch_operands = 0 : i64, tpu.core_type = #tpu.core_type<tc>, window_params = [{transform_indices = @transform_0, window_bounds = array<i64: 16, 32>}, {transform_indices = @transform_1, window_bounds = array<i64: 32, 50>}, {transform_indices = @transform_2, window_bounds = array<i64: 1, 50>}, {transform_indices = @transform_3, window_bounds = array<i64: 16, 50>}]} {
    %c0 = arith.constant 0 : index
    %c0_0 = arith.constant 0 : index
    %0 = vector.load %arg2[%c0, %c0_0] : memref<16x32xf32, #tpu.memory_space<vmem>>, vector<16x32xf32>
    %1 = arith.truncf %0 : vector<16x32xf32> to vector<16x32xbf16>
    %c0_1 = arith.constant 0 : index
    %c0_2 = arith.constant 0 : index
    %2 = vector.load %arg3[%c0_1, %c0_2] : memref<32x50xbf16, #tpu.memory_space<vmem>>, vector<32x50xbf16>
    %cst = arith.constant dense<0.000000e+00> : vector<16x50xf32>
    %3 = tpu.matmul %1, %2, %cst {dimension_numbers = #tpu.dot_dimension_numbers<[1], [0], [0], [1], [0, 0, 1, 1], [], []>} : vector<16x32xbf16>, vector<32x50xbf16>, vector<16x50xf32> -> vector<16x50xf32>
    %c0_3 = arith.constant 0 : index
    %c0_4 = arith.constant 0 : index
    %4 = vector.load %arg4[%c0_3, %c0_4] : memref<1x50xf32, #tpu.memory_space<vmem>>, vector<1x50xf32>
    %5 = vector.broadcast %4 : vector<1x50xf32> to vector<16x50xf32>
    %6 = arith.addf %3, %5 : vector<16x50xf32>
    %c0_5 = arith.constant 0 : index
    %c0_6 = arith.constant 0 : index
    %7 = vector.load %arg5[%c0_5, %c0_6] : memref<16x50xf32, #tpu.memory_space<vmem>>, vector<16x50xf32>
    tpu.vector_store %arg5[%c0_5, %c0_6], %6 {strides = array<i32>} : memref<16x50xf32, #tpu.memory_space<vmem>>, vector<16x50xf32>,
    return
  }
  func.func @transform_0(%arg0: i32, %arg1: i32) -> (i32, i32) {
    %c0_i32 = arith.constant 0 : i32
    %c0_i32_0 = arith.constant 0 : i32
    return %arg0, %c0_i32 : i32, i32
  }
  func.func @transform_1(%arg0: i32, %arg1: i32) -> (i32, i32) {
    %c0_i32 = arith.constant 0 : i32
    %c0_i32_0 = arith.constant 0 : i32
    return %c0_i32, %arg1 : i32, i32
  }
  func.func @transform_2(%arg0: i32, %arg1: i32) -> (i32, i32) {
    %c0_i32 = arith.constant 0 : i32
    %c0_i32_0 = arith.constant 0 : i32
    return %c0_i32, %arg1 : i32, i32
  }
  func.func @transform_3(%arg0: i32, %arg1: i32) -> (i32, i32) {
    %c0_i32 = arith.constant 0 : i32
    return %arg0, %arg1 : i32, i32
  }
}

module attributes {stable_mosaic.version = 11 : i64} {
  func.func @fused_attention_ln_kernel(%arg0: i32, %arg1: memref<1x8x32xf32, #tpu.memory_space<vmem>>, %arg2: memref<1x8x32xf32, #tpu.memory_space<vmem>>, %arg3: memref<1x1x8x8xf32, #tpu.memory_space<vmem>>, %arg4: memref<32x32xbf16, #tpu.memory_space<vmem>>, %arg5: memref<1x32xf32, #tpu.memory_space<vmem>>, %arg6: memref<32x64xbf16, #tpu.memory_space<vmem>>, %arg7: memref<1x64xf32, #tpu.memory_space<vmem>>, %arg8: memref<4x8x32xbf16, #tpu.memory_space<vmem>>, %arg9: memref<1x32xf32, #tpu.memory_space<vmem>>, %arg10: memref<1x32xf32, #tpu.memory_space<vmem>>, %arg11: memref<1x32xf32, #tpu.memory_space<vmem>>, %arg12: memref<1x8x32xf32, #tpu.memory_space<vmem>>) attributes {dimension_semantics = [#tpu.dimension_semantics<parallel>], iteration_bounds = array<i64: 2>, scalar_prefetch = 0 : i64, scratch_operands = 0 : i64, tpu.core_type = #tpu.core_type<tc>, window_params = [{transform_indices = @transform_0, window_bounds = array<i64: 1, 8, 32>}, {transform_indices = @transform_1, window_bounds = array<i64: 1, 8, 32>}, {transform_indices = @transform_2, window_bounds = array<i64: 1, 1, 8, 8>}, {pipeline_mode = #tpu.pipeline_mode<synchronous>, transform_indices = @transform_3, window_bounds = array<i64: 32, 32>}, {pipeline_mode = #tpu.pipeline_mode<synchronous>, transform_indices = @transform_4, window_bounds = array<i64: 1, 32>}, {pipeline_mode = #tpu.pipeline_mode<synchronous>, transform_indices = @transform_5, window_bounds = array<i64: 32, 64>}, {pipeline_mode = #tpu.pipeline_mode<synchronous>, transform_indices = @transform_6, window_bounds = array<i64: 1, 64>}, {pipeline_mode = #tpu.pipeline_mode<synchronous>, transform_indices = @transform_7, window_bounds = array<i64: 4, 8, 32>}, {pipeline_mode = #tpu.pipeline_mode<synchronous>, transform_indices = @transform_8, window_bounds = array<i64: 1, 32>}, {pipeline_mode = #tpu.pipeline_mode<synchronous>, transform_indices = @transform_9, window_bounds = array<i64: 1, 32>}, {pipeline_mode = #tpu.pipeline_mode<synchronous>, transform_indices = @transform_10, window_bounds = array<i64: 1, 32>}, {transform_indices = @transform_11, window_bounds = array<i64: 1, 8, 32>}]} {
    %c0 = arith.constant 0 : index
    %c0_0 = arith.constant 0 : index
    %c0_1 = arith.constant 0 : index
    %0 = vector.load %arg1[%c0, %c0_0, %c0_1] : memref<1x8x32xf32, #tpu.memory_space<vmem>>, vector<1x8x32xf32>
    %1 = vector.shape_cast %0 : vector<1x8x32xf32> to vector<8x32xf32>
    %c0_2 = arith.constant 0 : index
    %c0_3 = arith.constant 0 : index
    %c0_4 = arith.constant 0 : index
    %2 = vector.load %arg2[%c0_2, %c0_3, %c0_4] : memref<1x8x32xf32, #tpu.memory_space<vmem>>, vector<1x8x32xf32>
    %3 = vector.shape_cast %2 : vector<1x8x32xf32> to vector<8x32xf32>
    %4 = arith.truncf %1 : vector<8x32xf32> to vector<8x32xbf16>
    %5 = arith.truncf %3 : vector<8x32xf32> to vector<8x32xbf16>
    %c0_5 = arith.constant 0 : index
    %c0_6 = arith.constant 0 : index
    %6 = vector.load %arg4[%c0_5, %c0_6] : memref<32x32xbf16, #tpu.memory_space<vmem>>, vector<32x32xbf16>
    %cst = arith.constant dense<0.000000e+00> : vector<8x32xf32>
    %7 = tpu.matmul %4, %6, %cst {dimension_numbers = #tpu.dot_dimension_numbers<[1], [0], [0], [1], [0, 0, 1, 1], [], []>} : vector<8x32xbf16>, vector<32x32xbf16>, vector<8x32xf32> -> vector<8x32xf32>
    %c0_7 = arith.constant 0 : index
    %c0_8 = arith.constant 0 : index
    %8 = vector.load %arg5[%c0_7, %c0_8] : memref<1x32xf32, #tpu.memory_space<vmem>>, vector<1x32xf32>
    %9 = vector.broadcast %8 : vector<1x32xf32> to vector<8x32xf32>
    %10 = arith.addf %7, %9 : vector<8x32xf32>
    %c0_9 = arith.constant 0 : index
    %c0_10 = arith.constant 0 : index
    %11 = vector.load %arg6[%c0_9, %c0_10] : memref<32x64xbf16, #tpu.memory_space<vmem>>, vector<32x64xbf16>
    %cst_11 = arith.constant dense<0.000000e+00> : vector<8x64xf32>
    %12 = tpu.matmul %5, %11, %cst_11 {dimension_numbers = #tpu.dot_dimension_numbers<[1], [0], [0], [1], [0, 0, 1, 1], [], []>} : vector<8x32xbf16>, vector<32x64xbf16>, vector<8x64xf32> -> vector<8x64xf32>
    %c0_12 = arith.constant 0 : index
    %c0_13 = arith.constant 0 : index
    %13 = vector.load %arg7[%c0_12, %c0_13] : memref<1x64xf32, #tpu.memory_space<vmem>>, vector<1x64xf32>
    %14 = vector.broadcast %13 : vector<1x64xf32> to vector<8x64xf32>
    %15 = arith.addf %12, %14 : vector<8x64xf32>
    %16 = vector.extract_strided_slice %15 {offsets = [0, 0], sizes = [8, 32], strides = [1, 1]} : vector<8x64xf32> to vector<8x32xf32>
    %17 = vector.extract_strided_slice %15 {offsets = [0, 32], sizes = [8, 32], strides = [1, 1]} : vector<8x64xf32> to vector<8x32xf32>
    %18 = arith.truncf %10 : vector<8x32xf32> to vector<8x32xbf16>
    %19 = arith.truncf %16 : vector<8x32xf32> to vector<8x32xbf16>
    %20 = arith.truncf %17 : vector<8x32xf32> to vector<8x32xbf16>
    %c0_14 = arith.constant 0 : index
    %c0_15 = arith.constant 0 : index
    %c0_16 = arith.constant 0 : index
    %c0_17 = arith.constant 0 : index
    %21 = vector.load %arg3[%c0_14, %c0_15, %c0_16, %c0_17] : memref<1x1x8x8xf32, #tpu.memory_space<vmem>>, vector<1x1x8x8xf32>
    %22 = vector.shape_cast %21 : vector<1x1x8x8xf32> to vector<8x8xf32>
    %cst_18 = arith.constant 0.000000e+00 : f32
    %23 = vector.broadcast %cst_18 : f32 to vector<8x8xf32>
    %24 = arith.cmpf oeq, %22, %23 : vector<8x8xf32>
    %cst_19 = arith.constant -1.000000e+20 : f32
    %cst_20 = arith.constant 0.000000e+00 : f32
    %25 = vector.broadcast %cst_19 : f32 to vector<8x8xf32>
    %26 = vector.broadcast %cst_20 : f32 to vector<8x8xf32>
    %27 = arith.select %24, %25, %26 : vector<8x8xi1>, vector<8x8xf32>
    %cst_21 = arith.constant 0.000000e+00 : f32
    %28 = vector.broadcast %cst_21 : f32 to vector<8x32xf32>
    %29 = vector.extract_strided_slice %18 {offsets = [0, 0], sizes = [8, 8], strides = [1, 1]} : vector<8x32xbf16> to vector<8x8xbf16>
    %30 = vector.extract_strided_slice %19 {offsets = [0, 0], sizes = [8, 8], strides = [1, 1]} : vector<8x32xbf16> to vector<8x8xbf16>
    %31 = vector.extract_strided_slice %20 {offsets = [0, 0], sizes = [8, 8], strides = [1, 1]} : vector<8x32xbf16> to vector<8x8xbf16>
    %cst_22 = arith.constant dense<0.000000e+00> : vector<8x8xf32>
    %32 = tpu.matmul %29, %30, %cst_22 {dimension_numbers = #tpu.dot_dimension_numbers<[1], [1], [0], [0], [0, 0, 1, 0], [], []>} : vector<8x8xbf16>, vector<8x8xbf16>, vector<8x8xf32> -> vector<8x8xf32>
    %33 = arith.addf %32, %27 : vector<8x8xf32>
    %cst_23 = arith.constant dense<0xFF800000> : vector<8xf32>
    %34 = vector.multi_reduction <maximumf>, %33, %cst_23 [1] : vector<8x8xf32> to vector<8xf32>
    %35 = vector.shape_cast %34 : vector<8xf32> to vector<8x1xf32>
    %36 = vector.broadcast %35 : vector<8x1xf32> to vector<8x8xf32>
    %37 = arith.subf %33, %36 : vector<8x8xf32>
    %38 = math.exp %37 : vector<8x8xf32>
    %cst_24 = arith.constant dense<0.000000e+00> : vector<8xf32>
    %39 = vector.multi_reduction <add>, %38, %cst_24 [1] : vector<8x8xf32> to vector<8xf32>
    %40 = vector.shape_cast %39 : vector<8xf32> to vector<8x1xf32>
    %41 = tpu.reciprocal %40 {approx = true} : vector<8x1xf32> -> vector<8x1xf32>
    %42 = vector.broadcast %41 : vector<8x1xf32> to vector<8x8xf32>
    %43 = arith.mulf %38, %42 : vector<8x8xf32>
    %44 = arith.truncf %43 : vector<8x8xf32> to vector<8x8xbf16>
    %cst_25 = arith.constant dense<0.000000e+00> : vector<8x8xf32>
    %45 = tpu.matmul %44, %31, %cst_25 {dimension_numbers = #tpu.dot_dimension_numbers<[1], [0], [0], [1], [0, 0, 1, 1], [], []>} : vector<8x8xbf16>, vector<8x8xbf16>, vector<8x8xf32> -> vector<8x8xf32>
    %46 = arith.truncf %45 : vector<8x8xf32> to vector<8x8xbf16>
    %c0_26 = arith.constant 0 : index
    %c0_27 = arith.constant 0 : index
    %c0_28 = arith.constant 0 : index
    %47 = vector.load %arg8[%c0_26, %c0_27, %c0_28] : memref<4x8x32xbf16, #tpu.memory_space<vmem>>, vector<1x8x32xbf16>
    %48 = vector.shape_cast %47 : vector<1x8x32xbf16> to vector<8x32xbf16>
    %cst_29 = arith.constant dense<0.000000e+00> : vector<8x32xf32>
    %49 = tpu.matmul %46, %48, %cst_29 {dimension_numbers = #tpu.dot_dimension_numbers<[1], [0], [0], [1], [0, 0, 1, 1], [], []>} : vector<8x8xbf16>, vector<8x32xbf16>, vector<8x32xf32> -> vector<8x32xf32>
    %50 = arith.addf %28, %49 : vector<8x32xf32>
    %51 = vector.extract_strided_slice %18 {offsets = [0, 8], sizes = [8, 8], strides = [1, 1]} : vector<8x32xbf16> to vector<8x8xbf16>
    %52 = vector.extract_strided_slice %19 {offsets = [0, 8], sizes = [8, 8], strides = [1, 1]} : vector<8x32xbf16> to vector<8x8xbf16>
    %53 = vector.extract_strided_slice %20 {offsets = [0, 8], sizes = [8, 8], strides = [1, 1]} : vector<8x32xbf16> to vector<8x8xbf16>
    %cst_30 = arith.constant dense<0.000000e+00> : vector<8x8xf32>
    %54 = tpu.matmul %51, %52, %cst_30 {dimension_numbers = #tpu.dot_dimension_numbers<[1], [1], [0], [0], [0, 0, 1, 0], [], []>} : vector<8x8xbf16>, vector<8x8xbf16>, vector<8x8xf32> -> vector<8x8xf32>
    %55 = arith.addf %54, %27 : vector<8x8xf32>
    %cst_31 = arith.constant dense<0xFF800000> : vector<8xf32>
    %56 = vector.multi_reduction <maximumf>, %55, %cst_31 [1] : vector<8x8xf32> to vector<8xf32>
    %57 = vector.shape_cast %56 : vector<8xf32> to vector<8x1xf32>
    %58 = vector.broadcast %57 : vector<8x1xf32> to vector<8x8xf32>
    %59 = arith.subf %55, %58 : vector<8x8xf32>
    %60 = math.exp %59 : vector<8x8xf32>
    %cst_32 = arith.constant dense<0.000000e+00> : vector<8xf32>
    %61 = vector.multi_reduction <add>, %60, %cst_32 [1] : vector<8x8xf32> to vector<8xf32>
    %62 = vector.shape_cast %61 : vector<8xf32> to vector<8x1xf32>
    %63 = tpu.reciprocal %62 {approx = true} : vector<8x1xf32> -> vector<8x1xf32>
    %64 = vector.broadcast %63 : vector<8x1xf32> to vector<8x8xf32>
    %65 = arith.mulf %60, %64 : vector<8x8xf32>
    %66 = arith.truncf %65 : vector<8x8xf32> to vector<8x8xbf16>
    %cst_33 = arith.constant dense<0.000000e+00> : vector<8x8xf32>
    %67 = tpu.matmul %66, %53, %cst_33 {dimension_numbers = #tpu.dot_dimension_numbers<[1], [0], [0], [1], [0, 0, 1, 1], [], []>} : vector<8x8xbf16>, vector<8x8xbf16>, vector<8x8xf32> -> vector<8x8xf32>
    %68 = arith.truncf %67 : vector<8x8xf32> to vector<8x8xbf16>
    %c1 = arith.constant 1 : index
    %c0_34 = arith.constant 0 : index
    %c0_35 = arith.constant 0 : index
    %69 = vector.load %arg8[%c1, %c0_34, %c0_35] : memref<4x8x32xbf16, #tpu.memory_space<vmem>>, vector<1x8x32xbf16>
    %70 = vector.shape_cast %69 : vector<1x8x32xbf16> to vector<8x32xbf16>
    %cst_36 = arith.constant dense<0.000000e+00> : vector<8x32xf32>
    %71 = tpu.matmul %68, %70, %cst_36 {dimension_numbers = #tpu.dot_dimension_numbers<[1], [0], [0], [1], [0, 0, 1, 1], [], []>} : vector<8x8xbf16>, vector<8x32xbf16>, vector<8x32xf32> -> vector<8x32xf32>
    %72 = arith.addf %50, %71 : vector<8x32xf32>
    %73 = vector.extract_strided_slice %18 {offsets = [0, 16], sizes = [8, 8], strides = [1, 1]} : vector<8x32xbf16> to vector<8x8xbf16>
    %74 = vector.extract_strided_slice %19 {offsets = [0, 16], sizes = [8, 8], strides = [1, 1]} : vector<8x32xbf16> to vector<8x8xbf16>
    %75 = vector.extract_strided_slice %20 {offsets = [0, 16], sizes = [8, 8], strides = [1, 1]} : vector<8x32xbf16> to vector<8x8xbf16>
    %cst_37 = arith.constant dense<0.000000e+00> : vector<8x8xf32>
    %76 = tpu.matmul %73, %74, %cst_37 {dimension_numbers = #tpu.dot_dimension_numbers<[1], [1], [0], [0], [0, 0, 1, 0], [], []>} : vector<8x8xbf16>, vector<8x8xbf16>, vector<8x8xf32> -> vector<8x8xf32>
    %77 = arith.addf %76, %27 : vector<8x8xf32>
    %cst_38 = arith.constant dense<0xFF800000> : vector<8xf32>
    %78 = vector.multi_reduction <maximumf>, %77, %cst_38 [1] : vector<8x8xf32> to vector<8xf32>
    %79 = vector.shape_cast %78 : vector<8xf32> to vector<8x1xf32>
    %80 = vector.broadcast %79 : vector<8x1xf32> to vector<8x8xf32>
    %81 = arith.subf %77, %80 : vector<8x8xf32>
    %82 = math.exp %81 : vector<8x8xf32>
    %cst_39 = arith.constant dense<0.000000e+00> : vector<8xf32>
    %83 = vector.multi_reduction <add>, %82, %cst_39 [1] : vector<8x8xf32> to vector<8xf32>
    %84 = vector.shape_cast %83 : vector<8xf32> to vector<8x1xf32>
    %85 = tpu.reciprocal %84 {approx = true} : vector<8x1xf32> -> vector<8x1xf32>
    %86 = vector.broadcast %85 : vector<8x1xf32> to vector<8x8xf32>
    %87 = arith.mulf %82, %86 : vector<8x8xf32>
    %88 = arith.truncf %87 : vector<8x8xf32> to vector<8x8xbf16>
    %cst_40 = arith.constant dense<0.000000e+00> : vector<8x8xf32>
    %89 = tpu.matmul %88, %75, %cst_40 {dimension_numbers = #tpu.dot_dimension_numbers<[1], [0], [0], [1], [0, 0, 1, 1], [], []>} : vector<8x8xbf16>, vector<8x8xbf16>, vector<8x8xf32> -> vector<8x8xf32>
    %90 = arith.truncf %89 : vector<8x8xf32> to vector<8x8xbf16>
    %c2 = arith.constant 2 : index
    %c0_41 = arith.constant 0 : index
    %c0_42 = arith.constant 0 : index
    %91 = vector.load %arg8[%c2, %c0_41, %c0_42] : memref<4x8x32xbf16, #tpu.memory_space<vmem>>, vector<1x8x32xbf16>
    %92 = vector.shape_cast %91 : vector<1x8x32xbf16> to vector<8x32xbf16>
    %cst_43 = arith.constant dense<0.000000e+00> : vector<8x32xf32>
    %93 = tpu.matmul %90, %92, %cst_43 {dimension_numbers = #tpu.dot_dimension_numbers<[1], [0], [0], [1], [0, 0, 1, 1], [], []>} : vector<8x8xbf16>, vector<8x32xbf16>, vector<8x32xf32> -> vector<8x32xf32>
    %94 = arith.addf %72, %93 : vector<8x32xf32>
    %95 = vector.extract_strided_slice %18 {offsets = [0, 24], sizes = [8, 8], strides = [1, 1]} : vector<8x32xbf16> to vector<8x8xbf16>
    %96 = vector.extract_strided_slice %19 {offsets = [0, 24], sizes = [8, 8], strides = [1, 1]} : vector<8x32xbf16> to vector<8x8xbf16>
    %97 = vector.extract_strided_slice %20 {offsets = [0, 24], sizes = [8, 8], strides = [1, 1]} : vector<8x32xbf16> to vector<8x8xbf16>
    %cst_44 = arith.constant dense<0.000000e+00> : vector<8x8xf32>
    %98 = tpu.matmul %95, %96, %cst_44 {dimension_numbers = #tpu.dot_dimension_numbers<[1], [1], [0], [0], [0, 0, 1, 0], [], []>} : vector<8x8xbf16>, vector<8x8xbf16>, vector<8x8xf32> -> vector<8x8xf32>
    %99 = arith.addf %98, %27 : vector<8x8xf32>
    %cst_45 = arith.constant dense<0xFF800000> : vector<8xf32>
    %100 = vector.multi_reduction <maximumf>, %99, %cst_45 [1] : vector<8x8xf32> to vector<8xf32>
    %101 = vector.shape_cast %100 : vector<8xf32> to vector<8x1xf32>
    %102 = vector.broadcast %101 : vector<8x1xf32> to vector<8x8xf32>
    %103 = arith.subf %99, %102 : vector<8x8xf32>
    %104 = math.exp %103 : vector<8x8xf32>
    %cst_46 = arith.constant dense<0.000000e+00> : vector<8xf32>
    %105 = vector.multi_reduction <add>, %104, %cst_46 [1] : vector<8x8xf32> to vector<8xf32>
    %106 = vector.shape_cast %105 : vector<8xf32> to vector<8x1xf32>
    %107 = tpu.reciprocal %106 {approx = true} : vector<8x1xf32> -> vector<8x1xf32>
    %108 = vector.broadcast %107 : vector<8x1xf32> to vector<8x8xf32>
    %109 = arith.mulf %104, %108 : vector<8x8xf32>
    %110 = arith.truncf %109 : vector<8x8xf32> to vector<8x8xbf16>
    %cst_47 = arith.constant dense<0.000000e+00> : vector<8x8xf32>
    %111 = tpu.matmul %110, %97, %cst_47 {dimension_numbers = #tpu.dot_dimension_numbers<[1], [0], [0], [1], [0, 0, 1, 1], [], []>} : vector<8x8xbf16>, vector<8x8xbf16>, vector<8x8xf32> -> vector<8x8xf32>
    %112 = arith.truncf %111 : vector<8x8xf32> to vector<8x8xbf16>
    %c3 = arith.constant 3 : index
    %c0_48 = arith.constant 0 : index
    %c0_49 = arith.constant 0 : index
    %113 = vector.load %arg8[%c3, %c0_48, %c0_49] : memref<4x8x32xbf16, #tpu.memory_space<vmem>>, vector<1x8x32xbf16>
    %114 = vector.shape_cast %113 : vector<1x8x32xbf16> to vector<8x32xbf16>
    %cst_50 = arith.constant dense<0.000000e+00> : vector<8x32xf32>
    %115 = tpu.matmul %112, %114, %cst_50 {dimension_numbers = #tpu.dot_dimension_numbers<[1], [0], [0], [1], [0, 0, 1, 1], [], []>} : vector<8x8xbf16>, vector<8x32xbf16>, vector<8x32xf32> -> vector<8x32xf32>
    %116 = arith.addf %94, %115 : vector<8x32xf32>
    %c0_51 = arith.constant 0 : index
    %c0_52 = arith.constant 0 : index
    %117 = vector.load %arg9[%c0_51, %c0_52] : memref<1x32xf32, #tpu.memory_space<vmem>>, vector<1x32xf32>
    %118 = vector.broadcast %117 : vector<1x32xf32> to vector<8x32xf32>
    %119 = arith.addf %116, %118 : vector<8x32xf32>
    %120 = arith.addf %119, %1 : vector<8x32xf32>
    %cst_53 = arith.constant dense<0.000000e+00> : vector<8xf32>
    %121 = vector.multi_reduction <add>, %120, %cst_53 [1] : vector<8x32xf32> to vector<8xf32>
    %122 = vector.shape_cast %121 : vector<8xf32> to vector<8x1xf32>
    %cst_54 = arith.constant 3.200000e+01 : f32
    %123 = vector.broadcast %cst_54 : f32 to vector<8x1xf32>
    %124 = arith.divf %122, %123 : vector<8x1xf32>
    %125 = vector.broadcast %124 : vector<8x1xf32> to vector<8x32xf32>
    %126 = arith.subf %120, %125 : vector<8x32xf32>
    %127 = arith.mulf %126, %126 : vector<8x32xf32>
    %cst_55 = arith.constant dense<0.000000e+00> : vector<8xf32>
    %128 = vector.multi_reduction <add>, %127, %cst_55 [1] : vector<8x32xf32> to vector<8xf32>
    %129 = vector.shape_cast %128 : vector<8xf32> to vector<8x1xf32>
    %cst_56 = arith.constant 3.200000e+01 : f32
    %130 = vector.broadcast %cst_56 : f32 to vector<8x1xf32>
    %131 = arith.divf %129, %130 : vector<8x1xf32>
    %132 = vector.broadcast %124 : vector<8x1xf32> to vector<8x32xf32>
    %133 = arith.subf %120, %132 : vector<8x32xf32>
    %cst_57 = arith.constant 9.99999974E-6 : f32
    %134 = vector.broadcast %cst_57 : f32 to vector<8x1xf32>
    %135 = arith.addf %131, %134 : vector<8x1xf32>
    %136 = math.rsqrt %135 : vector<8x1xf32>
    %137 = vector.broadcast %136 : vector<8x1xf32> to vector<8x32xf32>
    %138 = arith.mulf %133, %137 : vector<8x32xf32>
    %c0_58 = arith.constant 0 : index
    %c0_59 = arith.constant 0 : index
    %139 = vector.load %arg10[%c0_58, %c0_59] : memref<1x32xf32, #tpu.memory_space<vmem>>, vector<1x32xf32>
    %140 = vector.broadcast %139 : vector<1x32xf32> to vector<8x32xf32>
    %141 = arith.mulf %138, %140 : vector<8x32xf32>
    %c0_60 = arith.constant 0 : index
    %c0_61 = arith.constant 0 : index
    %142 = vector.load %arg11[%c0_60, %c0_61] : memref<1x32xf32, #tpu.memory_space<vmem>>, vector<1x32xf32>
    %143 = vector.broadcast %142 : vector<1x32xf32> to vector<8x32xf32>
    %144 = arith.addf %141, %143 : vector<8x32xf32>
    %c0_62 = arith.constant 0 : index
    %c0_63 = arith.constant 0 : index
    %c0_64 = arith.constant 0 : index
    %145 = vector.load %arg12[%c0_62, %c0_63, %c0_64] : memref<1x8x32xf32, #tpu.memory_space<vmem>>, vector<1x8x32xf32>
    %146 = vector.shape_cast %145 : vector<1x8x32xf32> to vector<8x32xf32>
    %147 = vector.shape_cast %144 : vector<8x32xf32> to vector<1x8x32xf32>
    tpu.vector_store %arg12[%c0_62, %c0_63, %c0_64], %147 {strides = array<i32>} : memref<1x8x32xf32, #tpu.memory_space<vmem>>, vector<1x8x32xf32>,
    return
  }
  func.func @transform_0(%arg0: i32) -> (i32, i32, i32) {
    %c0_i32 = arith.constant 0 : i32
    %c0_i32_0 = arith.constant 0 : i32
    %c0_i32_1 = arith.constant 0 : i32
    return %arg0, %c0_i32, %c0_i32_0 : i32, i32, i32
  }
  func.func @transform_1(%arg0: i32) -> (i32, i32, i32) {
    %c0_i32 = arith.constant 0 : i32
    %c0_i32_0 = arith.constant 0 : i32
    %c0_i32_1 = arith.constant 0 : i32
    return %arg0, %c0_i32, %c0_i32_0 : i32, i32, i32
  }
  func.func @transform_2(%arg0: i32) -> (i32, i32, i32, i32) {
    %c0_i32 = arith.constant 0 : i32
    %c0_i32_0 = arith.constant 0 : i32
    %c0_i32_1 = arith.constant 0 : i32
    %c0_i32_2 = arith.constant 0 : i32
    return %arg0, %c0_i32, %c0_i32_0, %c0_i32_1 : i32, i32, i32, i32
  }
  func.func @transform_3(%arg0: i32) -> (i32, i32) {
    %c0_i32 = arith.constant 0 : i32
    %c0_i32_0 = arith.constant 0 : i32
    %c0_i32_1 = arith.constant 0 : i32
    return %c0_i32, %c0_i32_0 : i32, i32
  }
  func.func @transform_4(%arg0: i32) -> (i32, i32) {
    %c0_i32 = arith.constant 0 : i32
    %c0_i32_0 = arith.constant 0 : i32
    %c0_i32_1 = arith.constant 0 : i32
    return %c0_i32, %c0_i32_0 : i32, i32
  }
  func.func @transform_5(%arg0: i32) -> (i32, i32) {
    %c0_i32 = arith.constant 0 : i32
    %c0_i32_0 = arith.constant 0 : i32
    %c0_i32_1 = arith.constant 0 : i32
    return %c0_i32, %c0_i32_0 : i32, i32
  }
  func.func @transform_6(%arg0: i32) -> (i32, i32) {
    %c0_i32 = arith.constant 0 : i32
    %c0_i32_0 = arith.constant 0 : i32
    %c0_i32_1 = arith.constant 0 : i32
    return %c0_i32, %c0_i32_0 : i32, i32
  }
  func.func @transform_7(%arg0: i32) -> (i32, i32, i32) {
    %c0_i32 = arith.constant 0 : i32
    %c0_i32_0 = arith.constant 0 : i32
    %c0_i32_1 = arith.constant 0 : i32
    %c0_i32_2 = arith.constant 0 : i32
    return %c0_i32, %c0_i32_0, %c0_i32_1 : i32, i32, i32
  }
  func.func @transform_8(%arg0: i32) -> (i32, i32) {
    %c0_i32 = arith.constant 0 : i32
    %c0_i32_0 = arith.constant 0 : i32
    %c0_i32_1 = arith.constant 0 : i32
    return %c0_i32, %c0_i32_0 : i32, i32
  }
  func.func @transform_9(%arg0: i32) -> (i32, i32) {
    %c0_i32 = arith.constant 0 : i32
    %c0_i32_0 = arith.constant 0 : i32
    %c0_i32_1 = arith.constant 0 : i32
    return %c0_i32, %c0_i32_0 : i32, i32
  }
  func.func @transform_10(%arg0: i32) -> (i32, i32) {
    %c0_i32 = arith.constant 0 : i32
    %c0_i32_0 = arith.constant 0 : i32
    %c0_i32_1 = arith.constant 0 : i32
    return %c0_i32, %c0_i32_0 : i32, i32
  }
  func.func @transform_11(%arg0: i32) -> (i32, i32, i32) {
    %c0_i32 = arith.constant 0 : i32
    %c0_i32_0 = arith.constant 0 : i32
    %c0_i32_1 = arith.constant 0 : i32
    return %arg0, %c0_i32, %c0_i32_0 : i32, i32, i32
  }
}

</mosaic_0001>

<bundles_post_ra>
// kernel: decoder_forward.13
= control target key start
LH: loop header
LB: loop body
LE: loop exit
PB: predicated region body
PF: predicated region fallthrough
CT: control target
= control target key end

     0   :  { %v152_v1 = vmov 0.0   ;;  %vm153_vm0 = vmmov 0   ;;  %s204_s0 = inlined_call_operand.vmem [shape: f32[16,32], index: 0, kind: input, shape index: {}]   ;;  %s205_s1 = inlined_call_operand.vmem [shape: bf16[32,50], index: 1, kind: input, shape index: {}]   ;;  %s206_s2 = inlined_call_operand.vmem [shape: f32[1,50], index: 2, kind: input, shape index: {}]   ;;  %s207_s3 = inlined_call_operand.hbm [shape: f32[16,50], index: 3, kind: output, shape index: {}]  }
   0x1   :  { %v126_v0 = vld [vmem:[%s205_s1] sm:$0xff]   ;;  %113 = vmatprep.subr.bf16.mxu0 %v152_v1  ;;  %v127_v2 = vld [vmem:[%s205_s1 + $0x8] sm:$0xff]   ;;  %117 = vmatprep.mubr.msk.bf16.mxu0 %vm153_vm0, %v152_v1 }
   0x2   :  { %114 = vmatpush3.bf16.msra.mxu0 %v126_v0  ;;  %v16_v3 = vld [vmem:[%s204_s0] sm:$0xff]  ;;  %v17_v4 = vld [vmem:[%s204_s0 + $0x8] sm:$0xff] }
   0x3   :  { %115 = vmatprep.subr.bf16.mxu0 %v152_v1 }
   0x4   :  { %8 = vsyncpa [#allocation3], 0  ;;  %v18_v5 = vpack.c.bf16 %v17_v4, %v16_v3  ;;  %vm42_vm1 = vcmask 261120   ;;  %v106_v6 = vld [vmem:[%s206_s2] ss:$0 sm:$0xff]  ;;  %s154_s1 = smov [#allocation2]  }
   0x5   :  { %s95_s22 = sshll.u32 %s154_s1, 4  ;;  %vm87_vm2 = vcmask 408576   ;;  %s96_s22 = int_to_ptr.vmem [resolvable:$true] %s95_s22 }
   0x6   :  { %116 = vmatpush3.bf16.msra.mxu0 %v127_v2  ;;  %s128_s0 = scalar_lea.vmem %s96_s22, 256  ;;  %p133_p1 = scmp.lt.s32.totalorder %s96_s22, %s96_s22 }
   0x7   :  { %p129_p0 = scmp.ne.s32.totalorder %s96_s22, %s128_s0  ;;  %p134_p2 = scmp.lt.s32.totalorder %s128_s0, %s128_s0 }
   0x9   :  { %118 = vmatmul.mubr.msk.bf16.vlgmr.msra.gmra.mrb[0].mxu0 %vm42_vm1, %v18_v5  ;;  %p135_p3 = por %p134_p2, %p133_p1 }
   0xb   :  { %p136_p4 = pnand %p135_p3, %p129_p0 }
  0xdc   :  { %v80_v7 = vpop.f32.mrb[0].mxu0 }
  0xdd   :  { %v81_v8 = vadd.f32 %v106_v6, %v80_v7  ;;  %v119_v9 = vpop.f32.mrb[1].mxu0 }
  0xde   :  { %v83_v10 = vpop.f32.mrb[2].mxu0 }
  0xdf   :  { %88 = vst.msk [vmem:[#allocation2] sm:$0xff] %vm87_vm2, %v81_v8  ;;  %v84_v11 = vadd.f32 %v106_v6, %v83_v10  ;;  %v120_v12 = vpop.f32.mrb[3].mxu0 }
  0xe1   :  { %89 = vst.msk [vmem:[#allocation2 + $0x8] sm:$0xff] %vm87_vm2, %v84_v11 }
  0xe2   :  { %139 = shalt.err (!%p136_p4)
}
  0xe3   :  { %s140_s24 = scalar_lea.hbm %s207_s3, 256 }
  0xe4   :  { %p141_p5 = scmp.ne.s32.totalorder %s207_s3, %s140_s24  ;;  %p144_p6 = scmp.lt.u32.totalorder %s140_s24, %s207_s3 }
  0xe6   :  { %p146_p7 = pnand %p144_p6, %p141_p5 }
  0xe8   :  { %149 = shalt.err (!%p146_p7)
}
  0xe9   :  { %s155_s29 = smov 128   ;;  %s156_s30 = smov 8  }
  0xea   :  { %101 = dma.vmem_to_hbm [thread:$0]  %s96_s22, 256, %s207_s3, [#allocation3], %s155_s29, %s155_s29, %s156_s30  }
  0xeb   :  { %150 = dma.done.wait [#allocation3], 256  }
  0xec   :  { %151 = vsyncadd [#allocation3], 4294967040 }
  0xed   :  { %105 = vsyncpa [#allocation3], 1 }

// kernel: decoder_forward.9
= control target key start
LH: loop header
LB: loop body
LE: loop exit
PB: predicated region body
PF: predicated region fallthrough
CT: control target
= control target key end

     0   :  { %v337_v0 = vmov 0.0   ;;  %vm338_vm0 = vmmov 0   ;;  %vm53_vm1 = vcmask 261120   ;;  %s440_s1 = inlined_call_operand.vmem [shape: bf16[32,128], index: 1, kind: input, shape index: {}]   ;;  %s441_s0 = inlined_call_operand.vmem [shape: f32[16,32], index: 0, kind: input, shape index: {}]   ;;  %s442_s3 = inlined_call_operand.vmem [shape: bf16[128,32], index: 3, kind: input, shape index: {}]   ;;  %s443_s2 = inlined_call_operand.vmem [shape: f32[1,128], index: 2, kind: input, shape index: {}]   ;;  %s444_s4 = inlined_call_operand.vmem [shape: f32[1,32], index: 4, kind: input, shape index: {}]   ;;  %s445_s5 = inlined_call_operand.vmem [shape: f32[1,32], index: 5, kind: input, shape index: {}]   ;;  %s446_s6 = inlined_call_operand.vmem [shape: f32[1,32], index: 6, kind: input, shape index: {}]   ;;  %s447_s7 = inlined_call_operand.vmem [shape: f32[16,32], index: 7, kind: output, shape index: {}]  }
   0x1   :  { %293 = vmatprep.subr.bf16.mxu0 %v337_v0  ;;  %v323_v1 = vld [vmem:[%s440_s1] sm:$0xff]   ;;  %297 = vmatprep.mubr.msk.bf16.mxu0 %vm338_vm0, %v337_v0  ;;  %v324_v2 = vld [vmem:[%s440_s1 + $0x8] sm:$0xff]   ;;  %v327_v8 = vld [vmem:[%s442_s3 + $0x10] sm:$0xff]  }
   0x2   :  { %301 = vmatprep.subr.bf16.mxu1 %v337_v0  ;;  %317 = vmatprep.mubr.msk.bf16.mxu1 %vm338_vm0, %v337_v0  ;;  %v27_v3 = vld [vmem:[%s441_s0] sm:$0xff]  ;;  %v28_v4 = vld [vmem:[%s441_s0 + $0x8] sm:$0xff]  ;;  %v328_v9 = vld [vmem:[%s442_s3 + $0x18] sm:$0xff]  }
   0x3   :  { %294 = vmatpush3.bf16.msra.mxu0 %v323_v1  ;;  %v325_v5 = vld [vmem:[%s442_s3] sm:$0xff]   ;;  %v29_v6 = vpack.c.bf16 %v28_v4, %v27_v3  ;;  %v326_v7 = vld [vmem:[%s442_s3 + $0x8] sm:$0xff]   ;;  %v331_v12 = vld [vmem:[%s442_s3 + $0x30] sm:$0xff]  }
   0x4   :  { %295 = vmatprep.subr.bf16.mxu0 %v337_v0  ;;  %302 = vmatpush3.bf16.msra.mxu1 %v325_v5  ;;  %v329_v10 = vld [vmem:[%s442_s3 + $0x20] sm:$0xff]   ;;  %v330_v11 = vld [vmem:[%s442_s3 + $0x28] sm:$0xff]   ;;  %v332_v13 = vld [vmem:[%s442_s3 + $0x38] sm:$0xff]  }
   0x5   :  { %303 = vmatprep.subr.bf16.mxu1 %v337_v0  ;;  %v266_v14 = vld [vmem:[%s443_s2] ss:$0 sm:$0xff] }
   0x6   :  { %v270_v24 = vld [vmem:[%s444_s4] ss:$0 sm:$0xff] }
   0x7   :  { %296 = vmatpush3.bf16.msra.mxu0 %v324_v2  ;;  %v279_v52 = vld [vmem:[%s445_s5] ss:$0 sm:$0xff] }
   0x8   :  { %304 = vmatpush3.bf16.msra.mxu1 %v326_v7  ;;  %v280_v54 = vld [vmem:[%s446_s6] ss:$0 sm:$0xff] }
   0x9   :  { %305 = vmatprep.subr.bf16.mxu1 %v337_v0 }
   0xa   :  { %298 = vmatmul.mubr.msk.bf16.vlgmr.msra.gmra.mrb[0].mxu0 %vm53_vm1, %v29_v6 }
   0xc   :  { %306 = vmatpush3.bf16.msra.mxu1 %v327_v8 }
   0xd   :  { %307 = vmatprep.subr.bf16.mxu1 %v337_v0 }
  0x10   :  { %308 = vmatpush3.bf16.msra.mxu1 %v328_v9 }
  0x11   :  { %309 = vmatprep.subr.bf16.mxu1 %v337_v0 }
  0x14   :  { %310 = vmatpush3.bf16.msra.mxu1 %v329_v10 }
  0x15   :  { %311 = vmatprep.subr.bf16.mxu1 %v337_v0 }
  0x18   :  { %312 = vmatpush3.bf16.msra.mxu1 %v330_v11 }
  0x19   :  { %313 = vmatprep.subr.bf16.mxu1 %v337_v0 }
  0x1c   :  { %314 = vmatpush3.bf16.msra.mxu1 %v331_v12 }
  0x1d   :  { %315 = vmatprep.subr.bf16.mxu1 %v337_v0 }
  0x20   :  { %316 = vmatpush3.bf16.msra.mxu1 %v332_v13 }
  0xdd   :  { %v91_v15 = vpop.f32.mrb[0].mxu0 }
  0xde   :  { %v92_v16 = vadd.f32 %v266_v14, %v91_v15  ;;  %v299_v17 = vpop.f32.mrb[1].mxu0 }
  0xdf   :  { %v94_v18 = vpop.f32.mrb[2].mxu0 }
  0xe0   :  { %v95_v19 = vadd.f32 %v266_v14, %v94_v18  ;;  %v300_v20 = vpop.f32.mrb[3].mxu0  ;;  %v98_v21 = vmax.f32 %v92_v16, 0.0 }
  0xe2   :  { %v99_v22 = vmax.f32 %v95_v19, 0.0 }
  0xe4   :  { %v100_v23 = vpack.c.bf16 %v99_v22, %v98_v21 }
  0xe6   :  { %318 = vmatmul.mubr.bf16.vlgmr.msra.gmra.mrb[0].mxu1 %v100_v23 }
 0x1b9   :  { %v206_v25 = vpop.f32.mrb[0].mxu1 }
 0x1ba   :  { %v207_v26 = vadd.f32 %v270_v24, %v206_v25  ;;  %v319_v27 = vpop.f32.mrb[1].mxu1 }
 0x1bb   :  { %v209_v28 = vpop.f32.mrb[2].mxu1 }
 0x1bc   :  { %v210_v29 = vadd.f32 %v270_v24, %v209_v28  ;;  %v320_v30 = vpop.f32.mrb[3].mxu1  ;;  %v213_v31 = vadd.f32 %v207_v26, %v27_v3 }
 0x1be   :  { %v215_v32 = vsel %vm53_vm1, %v213_v31, 0.0  ;;  %v214_v33 = vadd.f32 %v210_v29, %v28_v4 }
 0x1bf   :  { %216 = vadd.xlane.f32.xlu0 %v215_v32 }
 0x1c0   :  { %v218_v34 = vsel %vm53_vm1, %v214_v33, 0.0 }
 0x1c3   :  { %219 = vadd.xlane.f32.xlu0 %v218_v34 }
 0x24c   :  { %v217_v35 = vpop.xlane.xlu0 %216 }
 0x24d   :  { %v222_v36 = vmul.f32 0.03125, %v217_v35 }
 0x24f   :  { %v224_v37 = vsub.f32 %v213_v31, %v222_v36 }
 0x250   :  { %v220_v38 = vpop.xlane.xlu0 %219 }
 0x251   :  { %v223_v39 = vmul.f32 0.03125, %v220_v38  ;;  %v226_v40 = vmul.f32 %v224_v37, %v224_v37 }
 0x253   :  { %v225_v41 = vsub.f32 %v214_v33, %v223_v39  ;;  %v228_v42 = vsel %vm53_vm1, %v226_v40, 0.0 }
 0x254   :  { %229 = vadd.xlane.f32.xlu1 %v228_v42 }
 0x255   :  { %v227_v43 = vmul.f32 %v225_v41, %v225_v41 }
 0x257   :  { %v231_v44 = vsel %vm53_vm1, %v227_v43, 0.0 }
 0x258   :  { %232 = vadd.xlane.f32.xlu1 %v231_v44 }
 0x2e1   :  { %v230_v45 = vpop.xlane.xlu1 %229 }
 0x2e2   :  { %v234_v46 = vmul.f32 0.03125, %v230_v45 }
 0x2e4   :  { %v236_v47 = vadd.f32 1e-05, %v234_v46 }
 0x2e5   :  { %v233_v48 = vpop.xlane.xlu1 %232 }
 0x2e6   :  { %333 = vrsqrt.f32 %v236_v47  ;;  %v235_v49 = vmul.f32 0.03125, %v233_v48 }
 0x2e8   :  { %v237_v50 = vadd.f32 1e-05, %v235_v49 }
 0x2ea   :  { %335 = vrsqrt.f32 %v237_v50 }
 0x2f0   :  { %v334_v51 = vpop.eup %333 }
 0x2f1   :  { %v240_v53 = vmul.f32 %v334_v51, %v224_v37 }
 0x2f3   :  { %v249_v55 = vmul.f32 %v279_v52, %v240_v53 }
 0x2f4   :  { %v336_v56 = vpop.eup %335 }
 0x2f5   :  { %v258_v57 = vadd.f32 %v280_v54, %v249_v55  ;;  %v241_v58 = vmul.f32 %v336_v56, %v225_v41 }
 0x2f7   :  { %260 = vst.msk [vmem:[%s447_s7] sm:$0xff] %vm53_vm1, %v258_v57  ;;  %v250_v59 = vmul.f32 %v279_v52, %v241_v58 }
 0x2f9   :  { %v259_v60 = vadd.f32 %v280_v54, %v250_v59 }
 0x2fb   :  { %261 = vst.msk [vmem:[%s447_s7 + $0x8] sm:$0xff] %vm53_vm1, %v259_v60 }

// kernel: decoder_forward.7
= control target key start
LH: loop header
LB: loop body
LE: loop exit
PB: predicated region body
PF: predicated region fallthrough
CT: control target
= control target key end

     0   :  { %s1584_s17 = smov 0   ;;  %s1764_s0 = inlined_call_operand.vmem [shape: f32[2,8,32], index: 0, kind: input, shape index: {}, may-alias: {0,1}]   ;;  %s1765_s1 = inlined_call_operand.vmem [shape: f32[2,8,32], index: 1, kind: input, shape index: {}, may-alias: {0,1}]   ;;  %s1766_s2 = inlined_call_operand.vmem [shape: f32[2,1,8,8], index: 2, kind: input, shape index: {}]   ;;  %s1767_s3 = inlined_call_operand.vmem [shape: bf16[32,32], index: 3, kind: input, shape index: {}]   ;;  %s1768_s4 = inlined_call_operand.vmem [shape: f32[1,32], index: 4, kind: input, shape index: {}]   ;;  %s1769_s5 = inlined_call_operand.vmem [shape: bf16[32,64], index: 5, kind: input, shape index: {}]   ;;  %s1770_s6 = inlined_call_operand.vmem [shape: f32[1,64], index: 6, kind: input, shape index: {}]   ;;  %s1771_s7 = inlined_call_operand.vmem [shape: bf16[4,8,32], index: 7, kind: input, shape index: {}]   ;;  %s1772_s8 = inlined_call_operand.vmem [shape: f32[1,32], index: 8, kind: input, shape index: {}]   ;;  %s1773_s9 = inlined_call_operand.vmem [shape: f32[1,32], index: 9, kind: input, shape index: {}]   ;;  %s1774_s10 = inlined_call_operand.vmem [shape: f32[1,32], index: 10, kind: input, shape index: {}]   ;;  %s1775_s11 = inlined_call_operand.vmem [shape: f32[2,8,32], index: 11, kind: output, shape index: {}]  }
   0x1 LB: > { %s1313_s18 = sadd.s32 4294967295, %s1513_s17   ;;  %p1317_p0 = scmp.ge.s32.totalorder %s1513_s17, 1  ;;  %s1513_s17 = sphi %s1584_s17, %s21_s17  }
   0x2   : > { %p354_p1 = scmp.lt.s32.totalorder %s1513_s17, 3 }
   0x4   : > { %p355_p2 = pnand %p1317_p0, %p354_p1 }
   0x5   : > { %v1485_v0 = vld [vmem:[%s1769_s5] sm:$0xff] (!%p355_p2)   ;;  %v1515_v1 = vmov (!%p355_p2), 0.0   ;;  %v1486_v2 = vld [vmem:[%s1769_s5 + $0x8] sm:$0xff] (!%p355_p2)   ;;  %vm1516_vm0 = vmmov (!%p355_p2), 0   ;;  %p400_p3 = scmp.lt.s32.totalorder (!%p355_p2), %s1313_s18, 1  ;;  %vm444_vm1 = vcmask (!%p355_p2), 261120  }
   0x6   : > { %358 = sbr.rel (%p355_p2) target bundleno = 2924 (0xb6c), region = 64  ;;  %1388 = vmatprep.subr.bf16.mxu1 (!%p355_p2), %v1515_v1  ;;  %1380 = vmatprep.subr.bf16.mxu0 (!%p355_p2), %v1515_v1  ;;  %v1487_v3 = vld [vmem:[%s1767_s3] sm:$0xff] (!%p355_p2)   ;;  %v1488_v4 = vld [vmem:[%s1767_s3 + $0x8] sm:$0xff] (!%p355_p2)   ;;  %vm559_vm2 = vcmask (!%p355_p2), 64512   ;;  %s1517_s20 = smov (!%p355_p2), 120   ;;  %vm624_vm4 = vcmask (!%p355_p2), 1043456  }
   0x7   : > { %1389 = vmatpush3.bf16.msra.mxu1 (!%p355_p2), %v1485_v0  ;;  %1392 = vmatprep.mubr.msk.bf16.mxu1 (!%p355_p2), %vm1516_vm0, %v1515_v1  ;;  %v1326_v9 = vld [vmem:[%s1770_s6] ss:$0 sm:$0xff] (!%p355_p2)  ;;  %s1518_s24 = smov (!%p355_p2), 96   ;;  %s1519_s25 = smov (!%p355_p2), 88   ;;  %v1334_v57 = vld [vmem:[%s1771_s7 + $0x4] sm:$0xf] (!%p355_p2) }
   0x8   : > { %1390 = vmatprep.subr.bf16.mxu1 (!%p355_p2), %v1515_v1  ;;  %1384 = vmatprep.mubr.msk.bf16.mxu0 (!%p355_p2), %vm1516_vm0, %v1515_v1  ;;  %v1322_v10 = vld [vmem:[%s1768_s4] ss:$0 sm:$0xff] (!%p355_p2)  ;;  %s1520_s26 = smov (!%p355_p2), 112   ;;  %v788_v58 = vsel (!%p355_p2), %vm624_vm4, %v1334_v57, 0  ;;  %s1521_s13 = smov (!%p355_p2), 80  }
   0x9   : > { %1381 = vmatpush3.bf16.msra.mxu0 (!%p355_p2), %v1487_v3  ;;  %v669_v63 = vld [vmem:[%s1771_s7] sm:$0xf] (!%p355_p2) }
   0xa   : > { %1382 = vmatprep.subr.bf16.mxu0 (!%p355_p2), %v1515_v1  ;;  %v834_v3 = vsel (!%p355_p2), %vm624_vm4, %v669_v63, 0 }
   0xb   : > { %1391 = vmatpush3.bf16.msra.mxu1 (!%p355_p2), %v1486_v2 }
   0xc   : > { %1402 = vmatprep.subr.bf16.mxu1 (!%p355_p2), %v1515_v1 }
   0xd   : > { %s1777_s18 = smov (!%p400_p3, %s1313_s18), 1  ;;  %1383 = vmatpush3.bf16.msra.mxu0 %v1488_v4 }
   0xe   : > { %s1612_s27 = sshll.u32 %s1777_s18, 3  ;;  %1396 = vmatprep.subr.bf16.mxu0 %v1515_v1  ;;  %s1523_s18 = smov 72  }
   0xf   : > { %s407_s30 = scalar_lea.vmem %s1765_s1, %s1612_s27  ;;  %s403_s14 = scalar_lea.vmem %s1764_s0, %s1612_s27 }
  0x10   : > { %v418_v5 = vld [vmem:[%s407_s30] sm:$0xff]  ;;  %s411_s23 = scalar_lea.vmem %s1766_s2, %s1612_s27  ;;  %s415_s30 = scalar_lea.vmem %s1775_s11, %s1612_s27 }
  0x11   : > { %v420_v6 = vpack.c.bf16 %v418_v5, %v418_v5  ;;  %v1623_v7 = vld [vmem:[%s403_s14] sm:$0xff]  ;;  %s1522_s14 = smov 104  }
  0x12   : > { %v419_v8 = vpack.c.bf16 %v1623_v7, %v1623_v7  ;;  %v556_v27 = vld [vmem:[%s411_s23] sm:$0xff] }
  0x13   : > { %1393 = vmatmul.mubr.msk.bf16.vlgmr.msra.gmra.mrb[0].mxu1 %vm444_vm1, %v420_v6  ;;  %vm557_vm3 = vcmp.eq.f32.partialorder %v556_v27, 0.0 }
  0x14   : > { %1385 = vmatmul.mubr.msk.bf16.vlgmr.msra.gmra.mrb[0].mxu0 %vm444_vm1, %v419_v8  ;;  %1404 = vmatprep.mubr.msk.bf16.mxu1 %vm1516_vm0, %v1515_v1  ;;  %v1663_v28 = vsel %vm557_vm3, -1e+20, %v1515_v1 }
  0x15   : > { %1398 = vmatprep.mubr.msk.bf16.mxu0 %vm1516_vm0, %v1515_v1 }
  0xe6   : > { %v548_v11 = vpop.f32.mrb[0].mxu1 }
  0xe7   : > { %v549_v12 = vadd.f32 %v1326_v9, %v548_v11  ;;  %v1394_v13 = vpop.f32.mrb[1].mxu1  ;;  %v482_v14 = vpop.f32.mrb[0].mxu0 }
  0xe8   : > { %v551_v15 = vpop.f32.mrb[2].mxu1  ;;  %v483_v16 = vadd.f32 %v1322_v10, %v482_v14  ;;  %v1386_v17 = vpop.f32.mrb[1].mxu0 }
  0xe9   : > { %v1640_v18 = vpack.c.bf16 %v549_v12, %v549_v12  ;;  %v1395_v19 = vpop.f32.mrb[3].mxu1  ;;  %v485_v20 = vpop.f32.mrb[2].mxu0 }
  0xea   : > { %v1387_v21 = vpop.f32.mrb[3].mxu0  ;;  %v1643_v22 = vpack.c.bf16 %v483_v16, %v483_v16 }
  0xeb   : > { %673 = vrot.lane.b32.xlu0 %v1640_v18, %s1517_s20  ;;  %v564_v23 = vsel %vm559_vm2, %v1640_v18, 0 }
  0xec   : > { %1397 = vmatpush3.bf16.xpose.msra.mxu0 %v564_v23 }
  0xed   : > { %1408 = vmatprep.subr.bf16.mxu0 %v1515_v1 }
  0xef   : > { %671 = vrot.lane.b32.xlu0 %v1643_v22, %s1517_s20 }
  0xf3   : > { %1399 = vmatmul.mubr.msk.bf16.vlgmr.msra.gmra.mrb[4].mxu0 %vm559_vm2, %v1643_v22 }
  0xf4   : > { %1410 = vmatprep.mubr.msk.bf16.mxu0 %vm1516_vm0, %v1515_v1 }
 0x15d   : > { %v674_v24 = vpop.permute.xlu0 %673 }
 0x15e   : > { %v679_v25 = vsel %vm559_vm2, %v674_v24, 0 }
 0x15f   : > { %1409 = vmatpush3.bf16.xpose.msra.mxu0 %v679_v25 }
 0x160   : > { %1420 = vmatprep.subr.bf16.mxu0 %v1515_v1 }
 0x161   : > { %v672_v26 = vpop.permute.xlu0 %671 }
 0x166   : > { %1411 = vmatmul.mubr.msk.bf16.vlgmr.msra.gmra.mrb[8].mxu0 %vm559_vm2, %v672_v26 }
 0x167   : > { %1422 = vmatprep.mubr.msk.bf16.mxu0 %vm1516_vm0, %v1515_v1  ;;  %1421 = vmatpush3.bf16.msra.mxu0 %v788_v58 }
 0x168   : > { %1432 = vmatprep.subr.bf16.mxu0 %v1515_v1 }
 0x1c6   : > { %v600_v29 = vpop.f32.mrb[4].mxu0 }
 0x1c7   : > { %v601_v30 = vadd.f32 %v600_v29, %v1663_v28  ;;  %v1400_v31 = vpop.f32.mrb[5].mxu0 }
 0x1c8   : > { %v603_v32 = vpop.f32.mrb[6].mxu0 }
 0x1c9   : > { %v1401_v33 = vpop.f32.mrb[7].mxu0  ;;  %v606_v34 = vsel %vm559_vm2, %v601_v30, -inf }
 0x1ca   : > { %607 = vmax.xlane.f32.xlu1 %v606_v34 }
 0x239   : > { %v715_v35 = vpop.f32.mrb[8].mxu0 }
 0x23a   : > { %v716_v36 = vadd.f32 %v715_v35, %v1663_v28  ;;  %v1412_v37 = vpop.f32.mrb[9].mxu0 }
 0x23b   : > { %v718_v38 = vpop.f32.mrb[10].mxu0 }
 0x23c   : > { %v1413_v39 = vpop.f32.mrb[11].mxu0  ;;  %v721_v40 = vsel %vm559_vm2, %v716_v36, -inf }
 0x23d   : > { %722 = vmax.xlane.f32.xlu1 %v721_v40 }
 0x24e   : > { %619 = vrot.lane.b32.xlu1 %v1640_v18, %s1518_s24 }
 0x257   : > { %v608_v41 = vpop.xlane.xlu1 %607 }
 0x258   : > { %v609_v42 = vsub.f32 %v601_v30, %v608_v41 }
 0x25a   : > { %v610_v43 = vmul.f32 1.442695, %v609_v42 }
 0x25c   : > { %1489 = vpow2.f32 %v610_v43 }
 0x266   : > { %v1490_v44 = vpop.eup %1489 }
 0x267   : > { %v612_v45 = vsel %vm559_vm2, %v1490_v44, 0.0 }
 0x268   : > { %613 = vadd.xlane.f32.xlu0 %v612_v45 }
 0x2ca   : > { %v723_v46 = vpop.xlane.xlu1 %722 }
 0x2cb   : > { %v724_v47 = vsub.f32 %v716_v36, %v723_v46 }
 0x2cd   : > { %v725_v48 = vmul.f32 1.442695, %v724_v47 }
 0x2ce   : > { %v620_v49 = vpop.permute.xlu1 %619 }
 0x2cf   : > { %1491 = vpow2.f32 %v725_v48  ;;  %v626_v50 = vsel %vm624_vm4, %v620_v49, 0  ;;  %v1339_v49 = vld [vmem:[%s1771_s7 + $0x8] sm:$0xf] }
 0x2d0   : > { %1403 = vmatpush3.bf16.msra.mxu1 %v626_v50  ;;  %v993_v50 = vsel %vm624_vm4, %v1339_v49, 0 }
 0x2d1   : > { %1414 = vmatprep.subr.bf16.mxu1 %v1515_v1 }
 0x2d9   : > { %v1492_v51 = vpop.eup %1491 }
 0x2da   : > { %v727_v52 = vsel %vm559_vm2, %v1492_v51, 0.0 }
 0x2db   : > { %728 = vadd.xlane.f32.xlu1 %v727_v52 }
 0x2ec   : > { %733 = vrot.lane.b32.xlu1 %v1640_v18, %s1519_s25 }
 0x2f0   : > { %878 = vrot.lane.b32.xlu1 %v1640_v18, %s1520_s26 }
 0x2f4   : > { %876 = vrot.lane.b32.xlu1 %v1643_v22, %s1520_s26 }
 0x2f5   : > { %v614_v53 = vpop.xlane.xlu0 %613 }
 0x2f6   : > { %1493 = vrcp.f32 %v614_v53 }
 0x300   : > { %v1494_v54 = vpop.eup %1493 }
 0x301   : > { %v616_v55 = vmul.f32 %v1494_v54, %v1490_v44 }
 0x303   : > { %v617_v56 = vpack.c.bf16 %v616_v55, %v616_v55 }
 0x305   : > { %1405 = vmatmul.mubr.msk.bf16.vlgmr.msra.gmra.mrb[4].mxu1 %vm559_vm2, %v617_v56 }
 0x306   : > { %1416 = vmatprep.mubr.msk.bf16.mxu1 %vm1516_vm0, %v1515_v1 }
 0x368   : > { %v729_v59 = vpop.xlane.xlu1 %728 }
 0x369   : > { %1495 = vrcp.f32 %v729_v59 }
 0x36c   : > { %v734_v60 = vpop.permute.xlu1 %733 }
 0x36d   : > { %v739_v61 = vsel %vm624_vm4, %v734_v60, 0 }
 0x36e   : > { %1415 = vmatpush3.bf16.msra.mxu1 %v739_v61 }
 0x36f   : > { %1426 = vmatprep.subr.bf16.mxu1 %v1515_v1 }
 0x370   : > { %v879_v10 = vpop.permute.xlu1 %878 }
 0x371   : > { %v884_v15 = vsel %vm559_vm2, %v879_v10, 0 }
 0x373   : > { %v1496_v62 = vpop.eup %1495 }
 0x374   : > { %v731_v0 = vmul.f32 %v1496_v62, %v1492_v51  ;;  %v877_v17 = vpop.permute.xlu1 %876 }
 0x376   : > { %v732_v2 = vpack.c.bf16 %v731_v0, %v731_v0 }
 0x378   : > { %1417 = vmatmul.mubr.msk.bf16.vlgmr.msra.gmra.mrb[8].mxu1 %vm559_vm2, %v732_v2 }
 0x379   : > { %1427 = vmatpush3.bf16.msra.mxu1 %v834_v3  ;;  %1428 = vmatprep.mubr.msk.bf16.mxu1 %vm1516_vm0, %v1515_v1 }
 0x37a   : > { %1438 = vmatprep.subr.bf16.mxu1 %v1515_v1 }
 0x3d8   : > { %v662_v4 = vpop.f32.mrb[4].mxu1 }
 0x3d9   : > { %v668_v5 = vpack.c.bf16 %v662_v4, %v662_v4  ;;  %v1406_v6 = vpop.f32.mrb[5].mxu1 }
 0x3da   : > { %v665_v8 = vpop.f32.mrb[6].mxu1 }
 0x3db   : > { %v1407_v9 = vpop.f32.mrb[7].mxu1  ;;  %1429 = vmatmul.mubr.msk.bf16.vlgmr.msra.gmra.mrb[12].mxu1 %vm559_vm2, %v668_v5 }
 0x3dc   : > { %1440 = vmatprep.mubr.msk.bf16.mxu1 %vm1516_vm0, %v1515_v1 }
 0x44b   : > { %v775_v11 = vpop.f32.mrb[8].mxu1 }
 0x44c   : > { %v781_v12 = vpack.c.bf16 %v775_v11, %v775_v11  ;;  %v1418_v13 = vpop.f32.mrb[9].mxu1 }
 0x44d   : > { %v778_v14 = vpop.f32.mrb[10].mxu1 }
 0x44e   : > { %v1419_v16 = vpop.f32.mrb[11].mxu1  ;;  %1423 = vmatmul.mubr.msk.bf16.vlgmr.msra.gmra.mrb[12].mxu0 %vm559_vm2, %v781_v12 }
 0x44f   : > { %1433 = vmatpush3.bf16.xpose.msra.mxu0 %v884_v15  ;;  %1434 = vmatprep.mubr.msk.bf16.mxu0 %vm1516_vm0, %v1515_v1 }
 0x450   : > { %1444 = vmatprep.subr.bf16.mxu0 %v1515_v1 }
 0x456   : > { %1435 = vmatmul.mubr.msk.bf16.vlgmr.msra.gmra.mrb[16].mxu0 %vm559_vm2, %v877_v17 }
 0x457   : > { %1446 = vmatprep.mubr.msk.bf16.mxu0 %vm1516_vm0, %v1515_v1  ;;  %1445 = vmatpush3.bf16.msra.mxu0 %v993_v50 }
 0x458   : > { %1456 = vmatprep.subr.bf16.mxu0 %v1515_v1 }
 0x4ae   : > { %v870_v19 = vpop.f32.mrb[12].mxu1 }
 0x4af   : > { %v1430_v20 = vpop.f32.mrb[13].mxu1 }
 0x4b0   : > { %v873_v21 = vpop.f32.mrb[14].mxu1 }
 0x4b1   : > { %v1431_v23 = vpop.f32.mrb[15].mxu1 }
 0x4b2   : > { %v1345_v23 = vld [vmem:[%s1772_s8] ss:$0 sm:$0xff] }
 0x521   : > { %v824_v24 = vpop.f32.mrb[12].mxu0 }
 0x522   : > { %v1706_v25 = vadd.f32 %v870_v19, %v824_v24  ;;  %v1424_v26 = vpop.f32.mrb[13].mxu0 }
 0x523   : > { %v827_v27 = vpop.f32.mrb[14].mxu0 }
 0x524   : > { %v1425_v29 = vpop.f32.mrb[15].mxu0 }
 0x529   : > { %v920_v30 = vpop.f32.mrb[16].mxu0 }
 0x52a   : > { %v921_v31 = vadd.f32 %v920_v30, %v1663_v28  ;;  %v1436_v32 = vpop.f32.mrb[17].mxu0 }
 0x52b   : > { %v923_v33 = vpop.f32.mrb[18].mxu0 }
 0x52c   : > { %v1437_v34 = vpop.f32.mrb[19].mxu0  ;;  %v926_v35 = vsel %vm559_vm2, %v921_v31, -inf }
 0x52d   : > { %927 = vmax.xlane.f32.xlu0 %v926_v35 }
 0x543   : > { %938 = vrot.lane.b32.xlu0 %v1640_v18, %s1521_s13 }
 0x547   : > { %1038 = vrot.lane.b32.xlu0 %v1640_v18, %s1522_s14 }
 0x54b   : > { %1036 = vrot.lane.b32.xlu0 %v1643_v22, %s1522_s14 }
 0x5ba   : > { %v928_v36 = vpop.xlane.xlu0 %927 }
 0x5bb   : > { %v929_v37 = vsub.f32 %v921_v31, %v928_v36 }
 0x5bd   : > { %v930_v38 = vmul.f32 1.442695, %v929_v37 }
 0x5be   : > { %v939_v39 = vpop.permute.xlu0 %938 }
 0x5bf   : > { %1497 = vpow2.f32 %v930_v38  ;;  %v944_v40 = vsel %vm624_vm4, %v939_v39, 0 }
 0x5c0   : > { %1439 = vmatpush3.bf16.msra.mxu1 %v944_v40 }
 0x5c1   : > { %1450 = vmatprep.subr.bf16.mxu1 %v1515_v1 }
 0x5c2   : > { %v1039_v46 = vpop.permute.xlu0 %1038 }
 0x5c3   : > { %v1044_v47 = vsel %vm559_vm2, %v1039_v46, 0 }
 0x5c6   : > { %v1037_v48 = vpop.permute.xlu0 %1036 }
 0x5c9   : > { %v1498_v41 = vpop.eup %1497 }
 0x5ca   : > { %v932_v42 = vsel %vm559_vm2, %v1498_v41, 0.0 }
 0x5cb   : > { %933 = vadd.xlane.f32.xlu1 %v932_v42  ;;  %v1347_v42 = vld [vmem:[%s1774_s10] ss:$0 sm:$0xff] }
 0x658   : > { %v934_v43 = vpop.xlane.xlu1 %933 }
 0x659   : > { %1499 = vrcp.f32 %v934_v43 }
 0x663   : > { %v1500_v44 = vpop.eup %1499 }
 0x664   : > { %v936_v45 = vmul.f32 %v1500_v44, %v1498_v41 }
 0x666   : > { %v937_v22 = vpack.c.bf16 %v936_v45, %v936_v45 }
 0x668   : > { %1441 = vmatmul.mubr.msk.bf16.vlgmr.msra.gmra.mrb[16].mxu1 %vm559_vm2, %v937_v22 }
 0x669   : > { %1451 = vmatpush3.bf16.xpose.msra.mxu1 %v1044_v47  ;;  %1452 = vmatprep.mubr.msk.bf16.mxu1 %vm1516_vm0, %v1515_v1 }
 0x66a   : > { %1462 = vmatprep.subr.bf16.mxu1 %v1515_v1 }
 0x670   : > { %1453 = vmatmul.mubr.msk.bf16.vlgmr.msra.gmra.mrb[20].mxu1 %vm559_vm2, %v1037_v48 }
 0x671   : > { %1464 = vmatprep.mubr.msk.bf16.mxu1 %vm1516_vm0, %v1515_v1 }
 0x73b   : > { %v980_v51 = vpop.f32.mrb[16].mxu1 }
 0x73c   : > { %v986_v52 = vpack.c.bf16 %v980_v51, %v980_v51  ;;  %v1442_v53 = vpop.f32.mrb[17].mxu1 }
 0x73d   : > { %v983_v54 = vpop.f32.mrb[18].mxu1 }
 0x73e   : > { %v1443_v55 = vpop.f32.mrb[19].mxu1  ;;  %1447 = vmatmul.mubr.msk.bf16.vlgmr.msra.gmra.mrb[20].mxu0 %vm559_vm2, %v986_v52 }
 0x73f   : > { %1458 = vmatprep.mubr.msk.bf16.mxu0 %vm1516_vm0, %v1515_v1  ;;  %v1343_v1 = vld [vmem:[%s1771_s7 + $0xc] sm:$0xf] }
 0x743   : > { %v1080_v56 = vpop.f32.mrb[20].mxu1 }
 0x744   : > { %v1081_v57 = vadd.f32 %v1080_v56, %v1663_v28  ;;  %v1454_v58 = vpop.f32.mrb[21].mxu1  ;;  %v1153_v28 = vsel %vm624_vm4, %v1343_v1, 0 }
 0x745   : > { %v1083_v59 = vpop.f32.mrb[22].mxu1  ;;  %1463 = vmatpush3.bf16.msra.mxu1 %v1153_v28 }
 0x746   : > { %v1455_v60 = vpop.f32.mrb[23].mxu1  ;;  %v1086_v61 = vsel %vm559_vm2, %v1081_v57, -inf }
 0x747   : > { %1087 = vmax.xlane.f32.xlu0 %v1086_v61 }
 0x7d4   : > { %v1088_v62 = vpop.xlane.xlu0 %1087 }
 0x7d5   : > { %v1089_v63 = vsub.f32 %v1081_v57, %v1088_v62 }
 0x7d7   : > { %v1090_v0 = vmul.f32 1.442695, %v1089_v63 }
 0x7d9   : > { %1501 = vpow2.f32 %v1090_v0 }
 0x7e3   : > { %v1502_v2 = vpop.eup %1501 }
 0x7e4   : > { %v1092_v3 = vsel %vm559_vm2, %v1502_v2, 0.0 }
 0x7e5   : > { %1093 = vadd.xlane.f32.xlu1 %v1092_v3 }
 0x7f6   : > { %1098 = vrot.lane.b32.xlu1 %v1640_v18, %s1523_s18 }
 0x811   : > { %v1029_v4 = vpop.f32.mrb[20].mxu0 }
 0x812   : > { %v1035_v5 = vadd.f32 %v1029_v4, %v1706_v25  ;;  %v1448_v6 = vpop.f32.mrb[21].mxu0 }
 0x813   : > { %v1032_v8 = vpop.f32.mrb[22].mxu0 }
 0x814   : > { %v1449_v9 = vpop.f32.mrb[23].mxu0 }
 0x872   : > { %v1094_v10 = vpop.xlane.xlu1 %1093 }
 0x873   : > { %1503 = vrcp.f32 %v1094_v10 }
 0x876   : > { %v1099_v11 = vpop.permute.xlu1 %1098 }
 0x877   : > { %v1104_v12 = vsel %vm624_vm4, %v1099_v11, 0 }
 0x878   : > { %1457 = vmatpush3.bf16.msra.mxu0 %v1104_v12 }
 0x87d   : > { %v1504_v18 = vpop.eup %1503 }
 0x87e   : > { %v1096_v13 = vmul.f32 %v1504_v18, %v1502_v2 }
 0x880   : > { %v1097_v14 = vpack.c.bf16 %v1096_v13, %v1096_v13 }
 0x882   : > { %1459 = vmatmul.mubr.msk.bf16.vlgmr.msra.gmra.mrb[24].mxu0 %vm559_vm2, %v1097_v14 }
 0x955   : > { %v1140_v15 = vpop.f32.mrb[24].mxu0 }
 0x956   : > { %v1146_v16 = vpack.c.bf16 %v1140_v15, %v1140_v15  ;;  %v1460_v17 = vpop.f32.mrb[25].mxu0 }
 0x957   : > { %v1143_v19 = vpop.f32.mrb[26].mxu0 }
 0x958   : > { %v1461_v20 = vpop.f32.mrb[27].mxu0  ;;  %1465 = vmatmul.mubr.msk.bf16.vlgmr.msra.gmra.mrb[24].mxu1 %vm559_vm2, %v1146_v16 }
 0xa2b   : > { %v1189_v21 = vpop.f32.mrb[24].mxu1 }
 0xa2c   : > { %v1195_v24 = vadd.f32 %v1189_v21, %v1035_v5  ;;  %v1466_v25 = vpop.f32.mrb[25].mxu1 }
 0xa2d   : > { %v1192_v26 = vpop.f32.mrb[26].mxu1 }
 0xa2e   : > { %v1203_v27 = vadd.f32 %v1345_v23, %v1195_v24  ;;  %v1467_v29 = vpop.f32.mrb[27].mxu1 }
 0xa30   : > { %v1204_v30 = vadd.f32 %v1203_v27, %v1623_v7  ;;  %v1346_v7 = vld [vmem:[%s1773_s9] ss:$0 sm:$0xff] }
 0xa32   : > { %v1205_v31 = vsel %vm444_vm1, %v1204_v30, 0.0 }
 0xa33   : > { %1206 = vadd.xlane.f32.xlu1 %v1205_v31 }
 0xac0   : > { %v1207_v32 = vpop.xlane.xlu1 %1206 }
 0xac1   : > { %v1209_v33 = vmul.f32 0.03125, %v1207_v32 }
 0xac3   : > { %v1210_v34 = vsub.f32 %v1204_v30, %v1209_v33 }
 0xac5   : > { %v1211_v35 = vmul.f32 %v1210_v34, %v1210_v34 }
 0xac7   : > { %v1212_v36 = vsel %vm444_vm1, %v1211_v35, 0.0 }
 0xac8   : > { %1213 = vadd.xlane.f32.xlu0 %v1212_v36 }
 0xb55   : > { %v1214_v37 = vpop.xlane.xlu0 %1213 }
 0xb56   : > { %v1215_v38 = vmul.f32 0.03125, %v1214_v37 }
 0xb58   : > { %v1216_v39 = vadd.f32 1e-05, %v1215_v38 }
 0xb5a   : > { %1505 = vrsqrt.f32 %v1216_v39 }
 0xb64   : > { %v1506_v40 = vpop.eup %1505 }
 0xb65   : > { %v1218_v41 = vmul.f32 %v1506_v40, %v1210_v34 }
 0xb67   : > { %v1226_v43 = vmul.f32 %v1346_v7, %v1218_v41 }
 0xb69   : > { %v1234_v44 = vadd.f32 %v1347_v42, %v1226_v43 }
 0xb6b   : > { %1235 = vst.msk [vmem:[%s415_s30] sm:$0xff] %vm444_vm1, %v1234_v44 }
 0xb6c PF: > { %s21_s17 = sadd.s32 1, %s1513_s17  }
 0xb6d   : > { %p18_p4 = scmp.ge.s32.totalorder %s21_s17, 4  }
 0xb6f   :  { %20 = sbr.rel (!%p18_p4) target bundleno = 1 (0x1), region = 103 }

</bundles_post_ra>
